<compile_context>
chip_gen: v7x
topology: tpu7x:2x2x1
jax: 0.10.0
libtpu: 0.0.40
codegen_flags: <defaults>
</compile_context>

<pallas_src>
import jax
import jax.numpy as jnp
from jax import lax
from jax.experimental import pallas as pl
from jax.experimental.pallas import tpu as pltpu

LANE = 128
_INV_SQRT2 = 0.7071067811865476  # 1/sqrt(2)


def _round_up(x, m):
    return ((x + m - 1) // m) * m


def _gelu_exact(x):
    # torch.nn.GELU() default is the exact (erf-based) formulation.
    # (Optional speed-over-parity: jax.nn.gelu(x, approximate=True) moves the
    #  activation onto the otherwise-idle EUP.)
    return 0.5 * x * (1.0 + lax.erf(x * _INV_SQRT2))


def cvae_kernel(x_ref, w1_ref, b1_ref, w2_ref, b2_ref, out_ref):
    w_dtype = w1_ref.dtype
    # Full-f32 MXU precision on the parity path; single bf16 pass otherwise.
    prec = lax.Precision.HIGHEST if w_dtype == jnp.float32 else None
    # In-kernel cast (VPU, hidden under the MXU) instead of a wrapper HBM pass.
    x = x_ref[...].astype(w_dtype)                                   # (TM, D)
    h = jnp.dot(x, w1_ref[...], preferred_element_type=jnp.float32,
                precision=prec)                                      # (TM, Hp)
    h = _gelu_exact(h + b1_ref[...])
    y = jnp.dot(h.astype(w_dtype), w2_ref[...],
                preferred_element_type=jnp.float32, precision=prec)  # (TM, D)
    out_ref[...] = (y + b2_ref[...]).astype(out_ref.dtype)


def prepare_params(w1, b1, w2, b2, compute_dtype=jnp.float32):
    """One-time parameter prep (do NOT call per forward).

    Torch layout in:  w1: (H, D), b1: (H,), w2: (D, H), b2: (D,).
    Weights are transposed to (in, out) layout; only the hidden dim is
    zero-padded to a lane (128) multiple.  Output dim stays at D.
    """
    H, D = w1.shape
    Hp = _round_up(H, LANE)
    w1_t = jnp.zeros((D, Hp), compute_dtype).at[:, :H].set(
        jnp.asarray(w1).T.astype(compute_dtype))
    b1_p = jnp.zeros((1, Hp), jnp.float32).at[:, :H].set(
        jnp.asarray(b1).astype(jnp.float32))
    w2_t = jnp.zeros((Hp, D), compute_dtype).at[:H, :].set(
        jnp.asarray(w2).T.astype(compute_dtype))
    b2_p = jnp.asarray(b2).astype(jnp.float32).reshape(1, D)
    return dict(w1=w1_t, b1=b1_p, w2=w2_t, b2=b2_p, D=D, H=H, Hp=Hp)


def _vmem_capacity_bytes():
    try:
        cap = int(getattr(pltpu.get_tpu_info(), "vmem_capacity_bytes", 0))
    except Exception:
        cap = 0
    return cap if cap > 0 else (64 << 20)   # conservative default (v7x-sized)


def _weight_bytes(d, h_pad, w_itemsize):
    # Single-buffered resident weights + f32 biases.
    return (d * h_pad + h_pad * d) * w_itemsize + (h_pad + d) * 4


def _pick_tile_m(n_rows, d, h_pad, w_isz, x_isz, o_isz):
    cap = _vmem_capacity_bytes()
    budget = int(cap * 0.70)          # ~90 MiB on v5e/v6e, ~45 MiB on v7x
    weight_bytes = _weight_bytes(d, h_pad, w_isz)
    # Per row of a tile: double-buffered x + out tiles, f32 intermediates.
    per_row = 2 * d * (x_isz + o_isz) + (h_pad + d) * 4
    sublane = max(8, 32 // min(w_isz, x_isz, o_isz))   # 8 f32, 16 bf16, 32 i8
    avail = budget - weight_bytes
    if avail < per_row * sublane:
        # TODO(synk): add a K-streamed fallback (inner 'arbitrary' grid axis +
        # f32 VMEM accumulator) so very large D fits on v7x's 64 MiB VMEM.
        raise ValueError(
            "CVAE weights do not fit resident in VMEM on this chip "
            f"(need ~{weight_bytes >> 20} MiB of {cap >> 20} MiB). "
            "Re-run prepare_params(..., compute_dtype=jnp.bfloat16).")
    tm = avail // per_row
    if n_rows <= tm:
        # Small problem: force >= 2 grid steps so a v7x megacore can shard the
        # 'parallel' axis across both TensorCores; keep sublane/MXU alignment.
        half = pl.cdiv(n_rows, 2)
        if half >= 256:
            tm = _round_up(half, 256)
        elif half >= 128:
            tm = _round_up(half, 128)
        else:
            tm = _round_up(max(half, 1), sublane)
    else:
        tm = max(256, (tm // 256) * 256)   # MXU-width multiples (v6e/v7x)
        tm = min(tm, 4096)
    return int(tm)


def _vmem_limit_bytes(tm, d, h_pad, w_isz, x_isz, o_isz):
    cap = _vmem_capacity_bytes()
    need = (_weight_bytes(d, h_pad, w_isz)
            + 2 * tm * d * (x_isz + o_isz)      # double-buffered x/out tiles
            + tm * (h_pad + d) * 4              # f32 intermediates
            + (4 << 20))                        # headroom
    return int(min(max(need, 32 << 20), int(cap * 0.9)))


def cvae_forward(x, params):
    """x: (..., D). params: output of prepare_params()."""
    orig_shape = x.shape
    out_dtype = x.dtype
    D, Hp = params["D"], params["Hp"]
    assert orig_shape[-1] == D
    w1, b1, w2, b2 = params["w1"], params["b1"], params["w2"], params["b2"]

    x2d = x.reshape(-1, D)                    # original dtype; cast in-kernel
    n = x2d.shape[0]
    w_isz = jnp.dtype(w1.dtype).itemsize
    x_isz = jnp.dtype(x2d.dtype).itemsize
    o_isz = jnp.dtype(out_dtype).itemsize

    tm = _pick_tile_m(n, D, Hp, w_isz, x_isz, o_isz)
    grid = (pl.cdiv(n, tm),)
    vmem_limit = _vmem_limit_bytes(tm, D, Hp, w_isz, x_isz, o_isz)

    cost = pl.CostEstimate(
        flops=4 * n * D * Hp,                        # two matmuls
        transcendentals=n * Hp,                      # erf
        bytes_accessed=n * D * (x_isz + o_isz) + 2 * D * Hp * w_isz
        + (Hp + D) * 4,
    )

    def build(single_buffer_weights):
        # Resident (constant-index) operands: single-buffer to halve their
        # VMEM footprint; x/out tiles keep the default double buffering.
        wmode = ({"pipeline_mode": pl.Buffered(1)}
                 if single_buffer_weights else {})
        return pl.pallas_call(
            cvae_kernel,
            out_shape=jax.ShapeDtypeStruct((n, D), out_dtype),
            grid_spec=pl.GridSpec(
                grid=grid,
                in_specs=[
                    pl.BlockSpec((tm, D), lambda i: (i, 0)),            # x
                    pl.BlockSpec((D, Hp), lambda i: (0, 0), **wmode),   # w1
                    pl.BlockSpec((1, Hp), lambda i: (0, 0), **wmode),   # b1
                    pl.BlockSpec((Hp, D), lambda i: (0, 0), **wmode),   # w2
                    pl.BlockSpec((1, D), lambda i: (0, 0), **wmode),    # b2
                ],
                out_specs=pl.BlockSpec((tm, D), lambda i: (i, 0)),
            ),
            compiler_params=pltpu.CompilerParams(
                dimension_semantics=("parallel",),
                vmem_limit_bytes=vmem_limit,
            ),
            cost_estimate=cost,
        )

    try:
        out = build(True)(x2d, w1, b1, w2, b2)
    except Exception:
        # Fallback if this jax build rejects Buffered(1); constant index maps
        # still keep the weights resident, just double-buffered.
        out = build(False)(x2d, w1, b1, w2, b2)

    return out.reshape(orig_shape)


def init_params(key, embedding_dim):
    """Deterministic init mirroring nn.Linear shapes (Kaiming-uniform-ish)."""
    D = embedding_dim
    H = D // 2
    k1, k2, k3, k4 = jax.random.split(key, 4)
    lim1 = 1.0 / jnp.sqrt(D)
    lim2 = 1.0 / jnp.sqrt(H)
    w1 = jax.random.uniform(k1, (H, D), jnp.float32, -lim1, lim1)  # Linear(D,H).weight
    b1 = jax.random.uniform(k2, (H,), jnp.float32, -lim1, lim1)
    w2 = jax.random.uniform(k3, (D, H), jnp.float32, -lim2, lim2)  # Linear(H,D).weight
    b2 = jax.random.uniform(k4, (D,), jnp.float32, -lim2, lim2)
    return w1, b1, w2, b2


if __name__ == "__main__":
    key = jax.random.PRNGKey(0)
    kx, kp = jax.random.split(key)

    batch, seq, embedding_dim = 2, 8, 32
    x = jax.random.normal(kx, (batch, seq, embedding_dim), jnp.float32)
    w1, b1, w2, b2 = init_params(kp, embedding_dim)

    # f32 compute path for PyTorch parity.  For speed over parity, pass
    # compute_dtype=jnp.bfloat16 (f32 accumulation retained in-kernel).
    params = prepare_params(w1, b1, w2, b2, compute_dtype=jnp.float32)

    y = cvae_forward(x, params)
    jax.block_until_ready(y)

    # Pure-JAX reference, same math as the PyTorch module (HIGHEST precision so
    # the reference matmuls are not silently bf16-decomposed on TPU).
    hp = lax.Precision.HIGHEST
    x2 = x.reshape(-1, embedding_dim)
    h_ref = jnp.dot(x2, w1.T, precision=hp) + b1
    h_ref = 0.5 * h_ref * (1.0 + lax.erf(h_ref * _INV_SQRT2))
    y_ref = (jnp.dot(h_ref, w2.T, precision=hp) + b2).reshape(x.shape)

    assert y.shape == x.shape and y.dtype == x.dtype
    assert jnp.allclose(y, y_ref, atol=1e-4, rtol=1e-4), "mismatch vs reference"

    print("KERNEL_OK")
</pallas_src>

<mosaic_0001>
module attributes {stable_mosaic.version = 11 : i64} {
  func.func @cvae_kernel(%arg0: i32, %arg1: memref<8x32xf32, #tpu.memory_space<vmem>>, %arg2: memref<32x128xf32, #tpu.memory_space<vmem>>, %arg3: memref<1x128xf32, #tpu.memory_space<vmem>>, %arg4: memref<128x32xf32, #tpu.memory_space<vmem>>, %arg5: memref<1x32xf32, #tpu.memory_space<vmem>>, %arg6: memref<8x32xf32, #tpu.memory_space<vmem>>) attributes {dimension_semantics = [#tpu.dimension_semantics<parallel>], iteration_bounds = array<i64: 2>, scalar_prefetch = 0 : i64, scratch_operands = 0 : i64, tpu.core_type = #tpu.core_type<tc>, window_params = [{transform_indices = @transform_0, window_bounds = array<i64: 8, 32>}, {pipeline_mode = #tpu.pipeline_mode<synchronous>, transform_indices = @transform_1, window_bounds = array<i64: 32, 128>}, {pipeline_mode = #tpu.pipeline_mode<synchronous>, transform_indices = @transform_2, window_bounds = array<i64: 1, 128>}, {pipeline_mode = #tpu.pipeline_mode<synchronous>, transform_indices = @transform_3, window_bounds = array<i64: 128, 32>}, {pipeline_mode = #tpu.pipeline_mode<synchronous>, transform_indices = @transform_4, window_bounds = array<i64: 1, 32>}, {transform_indices = @transform_5, window_bounds = array<i64: 8, 32>}]} {
    %c0 = arith.constant 0 : index
    %c0_0 = arith.constant 0 : index
    %0 = vector.load %arg1[%c0, %c0_0] : memref<8x32xf32, #tpu.memory_space<vmem>>, vector<8x32xf32>
    %c0_1 = arith.constant 0 : index
    %c0_2 = arith.constant 0 : index
    %1 = vector.load %arg2[%c0_1, %c0_2] : memref<32x128xf32, #tpu.memory_space<vmem>>, vector<32x128xf32>
    %cst = arith.constant dense<0.000000e+00> : vector<8x128xf32>
    %2 = tpu.matmul %0, %1, %cst {dimension_numbers = #tpu.dot_dimension_numbers<[1], [0], [0], [1], [0, 0, 1, 1], [], []>, precision = #tpu.contract_precision<fp32>} : vector<8x32xf32>, vector<32x128xf32>, vector<8x128xf32> -> vector<8x128xf32>
    %c0_3 = arith.constant 0 : index
    %c0_4 = arith.constant 0 : index
    %3 = vector.load %arg3[%c0_3, %c0_4] : memref<1x128xf32, #tpu.memory_space<vmem>>, vector<1x128xf32>
    %4 = vector.broadcast %3 : vector<1x128xf32> to vector<8x128xf32>
    %5 = arith.addf %2, %4 : vector<8x128xf32>
    %cst_5 = arith.constant 5.000000e-01 : f32
    %6 = vector.broadcast %cst_5 : f32 to vector<8x128xf32>
    %7 = arith.mulf %6, %5 : vector<8x128xf32>
    %cst_6 = arith.constant 0.707106769 : f32
    %8 = vector.broadcast %cst_6 : f32 to vector<8x128xf32>
    %9 = arith.mulf %5, %8 : vector<8x128xf32>
    %10 = math.erf %9 : vector<8x128xf32>
    %cst_7 = arith.constant 1.000000e+00 : f32
    %11 = vector.broadcast %cst_7 : f32 to vector<8x128xf32>
    %12 = arith.addf %11, %10 : vector<8x128xf32>
    %13 = arith.mulf %7, %12 : vector<8x128xf32>
    %c0_8 = arith.constant 0 : index
    %c0_9 = arith.constant 0 : index
    %14 = vector.load %arg4[%c0_8, %c0_9] : memref<128x32xf32, #tpu.memory_space<vmem>>, vector<128x32xf32>
    %cst_10 = arith.constant dense<0.000000e+00> : vector<8x32xf32>
    %15 = tpu.matmul %13, %14, %cst_10 {dimension_numbers = #tpu.dot_dimension_numbers<[1], [0], [0], [1], [0, 0, 1, 1], [], []>, precision = #tpu.contract_precision<fp32>} : vector<8x128xf32>, vector<128x32xf32>, vector<8x32xf32> -> vector<8x32xf32>
    %c0_11 = arith.constant 0 : index
    %c0_12 = arith.constant 0 : index
    %16 = vector.load %arg5[%c0_11, %c0_12] : memref<1x32xf32, #tpu.memory_space<vmem>>, vector<1x32xf32>
    %17 = vector.broadcast %16 : vector<1x32xf32> to vector<8x32xf32>
    %18 = arith.addf %15, %17 : vector<8x32xf32>
    %c0_13 = arith.constant 0 : index
    %c0_14 = arith.constant 0 : index
    %19 = vector.load %arg6[%c0_13, %c0_14] : memref<8x32xf32, #tpu.memory_space<vmem>>, vector<8x32xf32>
    tpu.vector_store %arg6[%c0_13, %c0_14], %18 {strides = array<i32>} : memref<8x32xf32, #tpu.memory_space<vmem>>, vector<8x32xf32>,
    return
  }
  func.func @transform_0(%arg0: i32) -> (i32, i32) {
    %c0_i32 = arith.constant 0 : i32
    %c0_i32_0 = arith.constant 0 : i32
    return %arg0, %c0_i32 : i32, i32
  }
  func.func @transform_1(%arg0: i32) -> (i32, i32) {
    %c0_i32 = arith.constant 0 : i32
    %c0_i32_0 = arith.constant 0 : i32
    %c0_i32_1 = arith.constant 0 : i32
    return %c0_i32, %c0_i32_0 : i32, i32
  }
  func.func @transform_2(%arg0: i32) -> (i32, i32) {
    %c0_i32 = arith.constant 0 : i32
    %c0_i32_0 = arith.constant 0 : i32
    %c0_i32_1 = arith.constant 0 : i32
    return %c0_i32, %c0_i32_0 : i32, i32
  }
  func.func @transform_3(%arg0: i32) -> (i32, i32) {
    %c0_i32 = arith.constant 0 : i32
    %c0_i32_0 = arith.constant 0 : i32
    %c0_i32_1 = arith.constant 0 : i32
    return %c0_i32, %c0_i32_0 : i32, i32
  }
  func.func @transform_4(%arg0: i32) -> (i32, i32) {
    %c0_i32 = arith.constant 0 : i32
    %c0_i32_0 = arith.constant 0 : i32
    %c0_i32_1 = arith.constant 0 : i32
    return %c0_i32, %c0_i32_0 : i32, i32
  }
  func.func @transform_5(%arg0: i32) -> (i32, i32) {
    %c0_i32 = arith.constant 0 : i32
    %c0_i32_0 = arith.constant 0 : i32
    return %arg0, %c0_i32 : i32, i32
  }
}

module attributes {stable_mosaic.version = 11 : i64} {
  func.func @cvae_kernel(%arg0: i32, %arg1: memref<8x32xf32, #tpu.memory_space<vmem>>, %arg2: memref<32x128xf32, #tpu.memory_space<vmem>>, %arg3: memref<1x128xf32, #tpu.memory_space<vmem>>, %arg4: memref<128x32xf32, #tpu.memory_space<vmem>>, %arg5: memref<1x32xf32, #tpu.memory_space<vmem>>, %arg6: memref<8x32xf32, #tpu.memory_space<vmem>>) attributes {dimension_semantics = [#tpu.dimension_semantics<parallel>], iteration_bounds = array<i64: 2>, scalar_prefetch = 0 : i64, scratch_operands = 0 : i64, tpu.core_type = #tpu.core_type<tc>, window_params = [{transform_indices = @transform_0, window_bounds = array<i64: 8, 32>}, {pipeline_mode = #tpu.pipeline_mode<synchronous>, transform_indices = @transform_1, window_bounds = array<i64: 32, 128>}, {pipeline_mode = #tpu.pipeline_mode<synchronous>, transform_indices = @transform_2, window_bounds = array<i64: 1, 128>}, {pipeline_mode = #tpu.pipeline_mode<synchronous>, transform_indices = @transform_3, window_bounds = array<i64: 128, 32>}, {pipeline_mode = #tpu.pipeline_mode<synchronous>, transform_indices = @transform_4, window_bounds = array<i64: 1, 32>}, {transform_indices = @transform_5, window_bounds = array<i64: 8, 32>}]} {
    %c0 = arith.constant 0 : index
    %c0_0 = arith.constant 0 : index
    %0 = vector.load %arg1[%c0, %c0_0] : memref<8x32xf32, #tpu.memory_space<vmem>>, vector<8x32xf32>
    %c0_1 = arith.constant 0 : index
    %c0_2 = arith.constant 0 : index
    %1 = vector.load %arg2[%c0_1, %c0_2] : memref<32x128xf32, #tpu.memory_space<vmem>>, vector<32x128xf32>
    %cst = arith.constant dense<0.000000e+00> : vector<8x128xf32>
    %2 = tpu.matmul %0, %1, %cst {dimension_numbers = #tpu.dot_dimension_numbers<[1], [0], [0], [1], [0, 0, 1, 1], [], []>, precision = #tpu.contract_precision<fp32>} : vector<8x32xf32>, vector<32x128xf32>, vector<8x128xf32> -> vector<8x128xf32>
    %c0_3 = arith.constant 0 : index
    %c0_4 = arith.constant 0 : index
    %3 = vector.load %arg3[%c0_3, %c0_4] : memref<1x128xf32, #tpu.memory_space<vmem>>, vector<1x128xf32>
    %4 = vector.broadcast %3 : vector<1x128xf32> to vector<8x128xf32>
    %5 = arith.addf %2, %4 : vector<8x128xf32>
    %cst_5 = arith.constant 5.000000e-01 : f32
    %6 = vector.broadcast %cst_5 : f32 to vector<8x128xf32>
    %7 = arith.mulf %6, %5 : vector<8x128xf32>
    %cst_6 = arith.constant 0.707106769 : f32
    %8 = vector.broadcast %cst_6 : f32 to vector<8x128xf32>
    %9 = arith.mulf %5, %8 : vector<8x128xf32>
    %10 = math.erf %9 : vector<8x128xf32>
    %cst_7 = arith.constant 1.000000e+00 : f32
    %11 = vector.broadcast %cst_7 : f32 to vector<8x128xf32>
    %12 = arith.addf %11, %10 : vector<8x128xf32>
    %13 = arith.mulf %7, %12 : vector<8x128xf32>
    %c0_8 = arith.constant 0 : index
    %c0_9 = arith.constant 0 : index
    %14 = vector.load %arg4[%c0_8, %c0_9] : memref<128x32xf32, #tpu.memory_space<vmem>>, vector<128x32xf32>
    %cst_10 = arith.constant dense<0.000000e+00> : vector<8x32xf32>
    %15 = tpu.matmul %13, %14, %cst_10 {dimension_numbers = #tpu.dot_dimension_numbers<[1], [0], [0], [1], [0, 0, 1, 1], [], []>, precision = #tpu.contract_precision<fp32>} : vector<8x128xf32>, vector<128x32xf32>, vector<8x32xf32> -> vector<8x32xf32>
    %c0_11 = arith.constant 0 : index
    %c0_12 = arith.constant 0 : index
    %16 = vector.load %arg5[%c0_11, %c0_12] : memref<1x32xf32, #tpu.memory_space<vmem>>, vector<1x32xf32>
    %17 = vector.broadcast %16 : vector<1x32xf32> to vector<8x32xf32>
    %18 = arith.addf %15, %17 : vector<8x32xf32>
    %c0_13 = arith.constant 0 : index
    %c0_14 = arith.constant 0 : index
    %19 = vector.load %arg6[%c0_13, %c0_14] : memref<8x32xf32, #tpu.memory_space<vmem>>, vector<8x32xf32>
    tpu.vector_store %arg6[%c0_13, %c0_14], %18 {strides = array<i32>} : memref<8x32xf32, #tpu.memory_space<vmem>>, vector<8x32xf32>,
    return
  }
  func.func @transform_0(%arg0: i32) -> (i32, i32) {
    %c0_i32 = arith.constant 0 : i32
    %c0_i32_0 = arith.constant 0 : i32
    return %arg0, %c0_i32 : i32, i32
  }
  func.func @transform_1(%arg0: i32) -> (i32, i32) {
    %c0_i32 = arith.constant 0 : i32
    %c0_i32_0 = arith.constant 0 : i32
    %c0_i32_1 = arith.constant 0 : i32
    return %c0_i32, %c0_i32_0 : i32, i32
  }
  func.func @transform_2(%arg0: i32) -> (i32, i32) {
    %c0_i32 = arith.constant 0 : i32
    %c0_i32_0 = arith.constant 0 : i32
    %c0_i32_1 = arith.constant 0 : i32
    return %c0_i32, %c0_i32_0 : i32, i32
  }
  func.func @transform_3(%arg0: i32) -> (i32, i32) {
    %c0_i32 = arith.constant 0 : i32
    %c0_i32_0 = arith.constant 0 : i32
    %c0_i32_1 = arith.constant 0 : i32
    return %c0_i32, %c0_i32_0 : i32, i32
  }
  func.func @transform_4(%arg0: i32) -> (i32, i32) {
    %c0_i32 = arith.constant 0 : i32
    %c0_i32_0 = arith.constant 0 : i32
    %c0_i32_1 = arith.constant 0 : i32
    return %c0_i32, %c0_i32_0 : i32, i32
  }
  func.func @transform_5(%arg0: i32) -> (i32, i32) {
    %c0_i32 = arith.constant 0 : i32
    %c0_i32_0 = arith.constant 0 : i32
    return %arg0, %c0_i32 : i32, i32
  }
}

</mosaic_0001>

<bundles_post_ra>
// kernel: tpu_custom_call.1
= control target key start
LH: loop header
LB: loop body
LE: loop exit
PB: predicated region body
PF: predicated region fallthrough
CT: control target
= control target key end

     0   :  { %10 = vsyncpa [#allocation3], 0  ;;  %s2693_s0 = inlined_call_operand.vmem [shape: f32[16,32], index: 0, kind: input, shape index: {}]   ;;  %s2694_s1 = inlined_call_operand.vmem [shape: f32[32,128], index: 1, kind: input, shape index: {}]   ;;  %s2695_s2 = inlined_call_operand.vmem [shape: f32[1,128], index: 2, kind: input, shape index: {}]   ;;  %s2696_s3 = inlined_call_operand.vmem [shape: f32[128,32], index: 3, kind: input, shape index: {}]   ;;  %s2697_s4 = inlined_call_operand.vmem [shape: f32[1,32], index: 4, kind: input, shape index: {}]   ;;  %s2698_s5 = inlined_call_operand.hbm [shape: f32[16,32], index: 5, kind: output, shape index: {}]  }
   0x1   :  { %12 = vsyncpa [#allocation3 + $0x1], 0  ;;  %s2227_s18 = smov 0   ;;  %s2229_s19 = smov 0  }
   0x2   :  { %s2231_s20 = smov 0   ;;  %s2233_s21 = smov 0  }
   0x3 LB: > { %s2248_s22 = sadd.s32 4294967295, %s2191_s21   ;;  %s1464_s23 = sadd.s32 4294967294, %s2191_s21   ;;  %s2191_s21 = sphi %s2233_s21, %s2704_s21   ;;  %s2187_s20 = sphi %s2231_s20, %s2703_s20   ;;  %s2183_s19 = sphi %s2229_s19, %s2702_s19   ;;  %s2179_s18 = sphi %s2227_s18, %s2701_s18  }
   0x4   : > { %s2252_s24 = sadd.s32 1, %s2191_s21   ;;  %s135_s25 = sadd.s32 1, %s2187_s20 }
   0x5   : > { %s132_s26 = ssub.s32 %s2191_s21, %s2252_s24  ;;  %p145_p0 = scmp.ne.s32.totalorder %s2187_s20, %s2183_s19 }
   0x6   : > { %p133_p1 = scmp.eq.s32.totalorder %s132_s26, 0  ;;  %p146_p2 = scmp.eq.s32.totalorder %s2248_s22, 1 }
   0x7   : > { %p151_p3 = scmp.ne.s32.totalorder %s2183_s19, %s2179_s18  ;;  %p152_p4 = scmp.eq.s32.totalorder %s1464_s23, 1 }
   0x8   : > { %s2263_s27 = scalar_select %p133_p1, %s2187_s20, %s135_s25  }
   0x9   : > { %p2265_p5 = por %p146_p2, %p145_p0  ;;  %p2269_p6 = por %p152_p4, %p151_p3 }
   0xa   : > { %p1467_p7 = scmp.ge.s32.totalorder %s2191_s21, 1  ;;  %p189_p8 = scmp.lt.s32.totalorder %s2191_s21, 3 }
   0xc   : > { %p190_p9 = pnand %p1467_p7, %p189_p8 }
   0xd   : > { %v221_v0 = vld [vmem:[%s2694_s1] sm:$0xff] (!%p190_p9)  ;;  %v222_v1 = vld [vmem:[%s2694_s1 + $0x8] sm:$0xff] (!%p190_p9)  ;;  %v223_v2 = vld [vmem:[%s2694_s1 + $0x10] sm:$0xff] (!%p190_p9)  ;;  %v2193_v3 = vmov (!%p190_p9), 0.0|0.0   ;;  %vm2194_vm0 = vmmov (!%p190_p9), 0   ;;  %v2195_v8 = vmov (!%p190_p9), 0.0  }
   0xe   : > { %193 = sbr.rel (%p190_p9) target bundleno = 636 (0x27c), region = 40  ;;  %1884 = vmatprep.subr.bf16.mxu0 (!%p190_p9), %v2193_v3  ;;  %v237_v4 = vand.u32 (!%p190_p9), 4294901760, %v221_v0  ;;  %v240_v5 = vand.u32 (!%p190_p9), 4294901760, %v222_v1  ;;  %v224_v6 = vld [vmem:[%s2694_s1 + $0x18] sm:$0xff] (!%p190_p9)  ;;  %v243_v7 = vand.u32 (!%p190_p9), 4294901760, %v223_v2  ;;  %1616 = vmatprep.mubr.msk.f32.mxu0 (!%p190_p9), %vm2194_vm0, %v2195_v8  ;;  %p216_p10 = scmp.lt.s32.totalorder (!%p190_p9), %s2248_s22, 1 }
   0xf   : > { %v246_v9 = vand.u32 (!%p190_p9), 4294901760, %v224_v6  ;;  %1968 = vmatprep.subr.bf16.mxu1 (!%p190_p9), %v2193_v3  ;;  %v2295_v10 = vld [vmem:[%s2696_s3] sm:$0xff] (!%p190_p9)  ;;  %v2300_v11 = vld [vmem:[%s2696_s3 + $0x8] sm:$0xff] (!%p190_p9)  ;;  %1776 = vmatprep.mubr.msk.f32.mxu1 (!%p190_p9), %vm2194_vm0, %v2195_v8  ;;  %vm232_vm1 = vcmask (!%p190_p9), 261120   ;;  %v2340_v26 = vld [vmem:[%s2696_s3 + $0x10] sm:$0xff] (!%p190_p9)  ;;  %s213_s26 = sand.u32 (!%p190_p9), 1, %s2183_s19  }
  0x10   : > { %v2304_v12 = vpack.c.bf16 (!%p190_p9), %v240_v5, %v237_v4  ;;  %v2306_v13 = vsub.f32 (!%p190_p9), %v221_v0, %v237_v4  ;;  %v2308_v14 = vsub.f32 (!%p190_p9), %v222_v1, %v240_v5  ;;  %v2310_v15 = vsub.f32 (!%p190_p9), %v223_v2, %v243_v7  ;;  %v2349_v31 = vld [vmem:[%s2696_s3 + $0x18] sm:$0xff] (!%p190_p9)  ;;  %v730_v56 = vld [vmem:[%s2696_s3 + $0x20] sm:$0xff] (!%p190_p9)  ;;  %v731_v57 = vld [vmem:[%s2696_s3 + $0x28] sm:$0xff] (!%p190_p9)  ;;  %s1473_s8 = sshll.u32 (!%p190_p9), %s2248_s22, 7  ;;  %s1392_s14 = scalar_lea.sflag (!%p190_p9), [#allocation3], %s213_s26 }
  0x11   : > { %v2313_v16 = vsub.f32 (!%p190_p9), %v224_v6, %v246_v9  ;;  %v750_v17 = vand.u32 (!%p190_p9), 4294901760, %v2295_v10  ;;  %v753_v18 = vand.u32 (!%p190_p9), 4294901760, %v2300_v11  ;;  %v2318_v19 = vpack.c.bf16 (!%p190_p9), %v246_v9, %v243_v7  ;;  %v732_v62 = vld [vmem:[%s2696_s3 + $0x30] sm:$0xff] (!%p190_p9)  ;;  %v733_v63 = vld [vmem:[%s2696_s3 + $0x38] sm:$0xff] (!%p190_p9)  ;;  %v734_v7 = vld [vmem:[%s2696_s3 + $0x40] sm:$0xff] (!%p190_p9)  ;;  %s2650_s13 = scalar_lea.hbm (!%p190_p9), %s2698_s5, %s1473_s8  ;;  %s2196_s15 = smov (!%p190_p9), [#allocation2]  }
  0x12   : > { %1886 = vmatpush3.bf16.msra.mxu0 (!%p190_p9), %v2304_v12  ;;  %v318_v20 = vand.u32 (!%p190_p9), 4294901760, %v2306_v13  ;;  %v325_v21 = vand.u32 (!%p190_p9), 4294901760, %v2308_v14  ;;  %v332_v25 = vand.u32 (!%p190_p9), 4294901760, %v2310_v15  ;;  %v756_v34 = vand.u32 (!%p190_p9), 4294901760, %v2340_v26  ;;  %v735_v9 = vld [vmem:[%s2696_s3 + $0x48] sm:$0xff] (!%p190_p9)  ;;  %s2133_s16 = sshll.u32 (!%p190_p9), %s2196_s15, 4  ;;  %s2134_s16 = int_to_ptr.vmem [resolvable:$false] %s2133_s16 }
  0x13   : > { %1887 = vmatprep.subr.bf16.mxu0 (!%p190_p9), %v2193_v3  ;;  %v2329_v22 = vsub.f32 (!%p190_p9), %v2295_v10, %v750_v17  ;;  %v2334_v23 = vsub.f32 (!%p190_p9), %v2300_v11, %v753_v18  ;;  %v339_v30 = vand.u32 (!%p190_p9), 4294901760, %v2313_v16  ;;  %v759_v37 = vand.u32 (!%p190_p9), 4294901760, %v2349_v31 }
  0x14   : > { %v319_v28 = vsub.f32 (!%p190_p9), %v2306_v13, %v318_v20  ;;  %v326_v29 = vsub.f32 (!%p190_p9), %v2308_v14, %v325_v21  ;;  %v333_v36 = vsub.f32 (!%p190_p9), %v2310_v15, %v332_v25  ;;  %v2362_v41 = vsub.f32 (!%p190_p9), %v2340_v26, %v756_v34  ;;  %v738_v26 = vld [vmem:[%s2696_s3 + $0x60] sm:$0xff] (!%p190_p9) }
  0x15   : > { %s217_s17 = scalar_select %p216_p10, %s2248_s22, 1  ;;  %v1969_v33 = vpack.c.bf16 %v2334_v23, %v2329_v22  ;;  %v340_v40 = vsub.f32 %v2313_v16, %v339_v30  ;;  %v2368_v43 = vsub.f32 %v2349_v31, %v759_v37  ;;  %v1897_v51 = vpack.c.bf16 %v2308_v14, %v2306_v13 }
  0x16   : > { %1889 = vmatpush3.bf16.msra.mxu0 %v2318_v19  ;;  %v320_v38 = vand.u32 4294901760, %v319_v28  ;;  %v327_v39 = vand.u32 4294901760, %v326_v29  ;;  %v334_v47 = vand.u32 4294901760, %v333_v36  ;;  %v1900_v52 = vpack.c.bf16 %v2313_v16, %v2310_v15  ;;  %v736_v16 = vld [vmem:[%s2696_s3 + $0x50] sm:$0xff] }
  0x17   : > { %s1469_s23 = sshll.u32 %s217_s17, 3  ;;  %1890 = vmatprep.subr.bf16.mxu0 %v2193_v3  ;;  %1970 = vmatpush3.bf16.msra.mxu1 %v1969_v33  ;;  %v1972_v45 = vpack.c.bf16 %v2368_v43, %v2362_v41  ;;  %v341_v48 = vand.u32 4294901760, %v340_v40  ;;  %v1909_v53 = vpack.c.bf16 %v325_v21, %v318_v20  ;;  %v1912_v54 = vpack.c.bf16 %v339_v30, %v332_v25  ;;  %s2135_s17 = scalar_lea.vmem %s2134_s16, 256 }
  0x18   : > { %s219_s30 = scalar_lea.vmem %s2693_s0, %s1469_s23  ;;  %1971 = vmatprep.subr.bf16.mxu1 %v2193_v3  ;;  %v1891_v46 = vpack.c.bf16 %v327_v39, %v320_v38  ;;  %v2404_v55 = vpack.c.bf16 %v753_v18, %v750_v17  ;;  %v762_v58 = vand.u32 4294901760, %v730_v56  ;;  %v765_v59 = vand.u32 4294901760, %v731_v57  ;;  %v737_v17 = vld [vmem:[%s2696_s3 + $0x58] sm:$0xff] }
  0x19   : > { %v220_v24 = vld [vmem:[%s219_s30] sm:$0xff]  ;;  %v1894_v50 = vpack.c.bf16 %v341_v48, %v334_v47  ;;  %v768_v1 = vand.u32 4294901760, %v732_v62  ;;  %v771_v2 = vand.u32 4294901760, %v733_v63  ;;  %v2433_v4 = vpack.c.bf16 %v759_v37, %v756_v34  ;;  %v740_v34 = vld [vmem:[%s2696_s3 + $0x70] sm:$0xff]  ;;  %s1468_s30 = sshll.u32 %s213_s26, 3 }
  0x1a   : > { %v234_v27 = vsel %vm232_vm1, %v220_v24, 0  ;;  %v2417_v60 = vsub.f32 %v730_v56, %v762_v58  ;;  %v2419_v61 = vsub.f32 %v731_v57, %v765_v59  ;;  %v774_v11 = vand.u32 4294901760, %v734_v7  ;;  %s215_s9 = scalar_lea.vmem [#allocation2], %s1468_s30 }
  0x1b   : > { %v305_v32 = vand.u32 4294901760, %v234_v27  ;;  %1973 = vmatpush3.bf16.msra.mxu1 %v1972_v45  ;;  %v2435_v5 = vsub.f32 %v732_v62, %v768_v1  ;;  %v2437_v6 = vsub.f32 %v733_v63, %v771_v2  ;;  %v2450_v13 = vpack.c.bf16 %v765_v59, %v762_v58  ;;  %s1405_s10 = sshll.u32 %s215_s9, 4  ;;  %s2652_s10 = int_to_ptr.vmem [resolvable:$true] %s1405_s10 }
  0x1c   : > { %1974 = vmatprep.subr.bf16.mxu1 %v2193_v3  ;;  %v1975_v0 = vpack.c.bf16 %v2419_v61, %v2417_v60  ;;  %v2452_v14 = vsub.f32 %v734_v7, %v774_v11  ;;  %v783_v20 = vand.u32 4294901760, %v737_v17  ;;  %v2467_v21 = vpack.c.bf16 %v771_v2, %v768_v1  ;;  %s2129_s22 = scalar_lea.vmem %s2652_s10, 128  ;;  %p2136_p0 = scmp.lt.s32.totalorder %s2652_s10, %s2134_s16 }
  0x1d   : > { %v306_v35 = vsub.f32 %v234_v27, %v305_v32  ;;  %v1978_v10 = vpack.c.bf16 %v2437_v6, %v2435_v5  ;;  %v739_v27 = vld [vmem:[%s2696_s3 + $0x68] sm:$0xff]  ;;  %v786_v29 = vand.u32 4294901760, %v738_v26  ;;  %v792_v37 = vand.u32 4294901760, %v740_v34  ;;  %p2130_p11 = scmp.ne.s32.totalorder %s2652_s10, %s2129_s22  ;;  %p2137_p1 = scmp.lt.s32.totalorder %s2135_s17, %s2129_s22 }
  0x1e   : > { %v2471_v25 = vsub.f32 %v737_v17, %v783_v20  ;;  %v789_v30 = vand.u32 4294901760, %v739_v27  ;;  %v871_v47 = vand.u32 4294901760, %v2417_v60  ;;  %v878_v48 = vand.u32 4294901760, %v2419_v61 }
  0x1f   : > { %v307_v42 = vand.u32 4294901760, %v306_v35  ;;  %1976 = vmatpush3.bf16.msra.mxu1 %v1975_v0  ;;  %v940_v40 = vsub.f32 %v740_v34, %v792_v37  ;;  %v899_v63 = vand.u32 4294901760, %v2452_v14  ;;  %p2131_p12 = pnand %p2130_p11, %p2265_p5  ;;  %p2138_p2 = por %p2137_p1, %p2136_p0 }
  0x20   : > { %1977 = vmatprep.subr.bf16.mxu1 %v2193_v3  ;;  %v2488_v33 = vsub.f32 %v739_v27, %v789_v30  ;;  %v2506_v45 = vpack.c.bf16 %v789_v30, %v786_v29 }
  0x21   : > { %v308_v44 = vsub.f32 %v306_v35, %v307_v42  ;;  %v941_v27 = vand.u32 4294901760, %v940_v40  ;;  %p2132_p13 = pneg %p2131_p12 }
  0x23   : > { %v309_v49 = vand.u32 4294901760, %v308_v44  ;;  %1979 = vmatpush3.bf16.msra.mxu1 %v1978_v10  ;;  %p2139_p3 = pnand %p2138_p2, %p2132_p13 }
  0x24   : > { %1980 = vmatprep.subr.bf16.mxu1 %v2193_v3 }
  0x25   : > { %1617 = vmatmul.mubr.f32.vlgmr.msra.gmra.mrb[0].mxu0 %v309_v49  ;;  %v872_v49 = vsub.f32 %v2417_v60, %v871_v47 }
  0x26   : > { %1892 = vmatpush3.bf16.msra.mxu0 %v1891_v46  ;;  %1627 = vmatprep.mubr.msk.f32.mxu0 %vm2194_vm0, %v2195_v8 }
  0x27   : > { %1893 = vmatprep.subr.bf16.mxu0 %v2193_v3 }
  0x2a   : > { %1895 = vmatpush3.bf16.msra.mxu0 %v1894_v50  ;;  %v879_v50 = vsub.f32 %v2419_v61, %v878_v48  ;;  %v900_v61 = vsub.f32 %v2452_v14, %v899_v63 }
  0x2b   : > { %1896 = vmatprep.subr.bf16.mxu0 %v2193_v3 }
  0x2c   : > { %v901_v2 = vand.u32 4294901760, %v900_v61 }
  0x2d   : > { %1628 = vmatmul.mubr.f32.vlgmr.msra.gmra.mrb[0].mxu0 %v305_v32 }
  0x2e   : > { %1898 = vmatpush3.bf16.msra.mxu0 %v1897_v51  ;;  %1638 = vmatprep.mubr.msk.f32.mxu0 %vm2194_vm0, %v2195_v8  ;;  %v873_v51 = vand.u32 4294901760, %v872_v49 }
  0x2f   : > { %1899 = vmatprep.subr.bf16.mxu0 %v2193_v3 }
  0x32   : > { %1901 = vmatpush3.bf16.msra.mxu0 %v1900_v52  ;;  %v880_v52 = vand.u32 4294901760, %v879_v50 }
  0x33   : > { %1902 = vmatprep.subr.bf16.mxu0 %v2193_v3 }
  0x34   : > { %v2521_v56 = vpack.c.bf16 %v880_v52, %v873_v51  ;;  %v850_v52 = vand.u32 4294901760, %v2334_v23 }
  0x35   : > { %1639 = vmatmul.mubr.f32.vlgmr.msra.gmra.mrb[0].mxu0 %v306_v35  ;;  %v741_v35 = vld [vmem:[%s2696_s3 + $0x78] sm:$0xff] }
  0x36   : > { %1904 = vmatpush3.bf16.msra.mxu0 %v2304_v12  ;;  %1649 = vmatprep.mubr.msk.f32.mxu0 %vm2194_vm0, %v2195_v8  ;;  %v795_v38 = vand.u32 4294901760, %v741_v35 }
  0x37   : > { %1905 = vmatprep.subr.bf16.mxu0 %v2193_v3 }
  0x38   : > { %v2511_v46 = vpack.c.bf16 %v795_v38, %v792_v37 }
  0x3a   : > { %1907 = vmatpush3.bf16.msra.mxu0 %v2318_v19 }
  0x3b   : > { %1908 = vmatprep.subr.bf16.mxu0 %v2193_v3 }
  0x3d   : > { %1650 = vmatmul.mubr.f32.vlgmr.msra.gmra.mrb[0].mxu0 %v307_v42  ;;  %v947_v42 = vsub.f32 %v741_v35, %v795_v38 }
  0x3e   : > { %1910 = vmatpush3.bf16.msra.mxu0 %v1909_v53  ;;  %1660 = vmatprep.mubr.msk.f32.mxu0 %vm2194_vm0, %v2195_v8  ;;  %v885_v53 = vand.u32 4294901760, %v2435_v5 }
  0x3f   : > { %1911 = vmatprep.subr.bf16.mxu0 %v2193_v3  ;;  %v1990_v44 = vpack.c.bf16 %v947_v42, %v940_v40 }
  0x40   : > { %v886_v57 = vsub.f32 %v2435_v5, %v885_v53  ;;  %v920_v5 = vand.u32 4294901760, %v2471_v25 }
  0x42   : > { %1913 = vmatpush3.bf16.msra.mxu0 %v1912_v54  ;;  %v892_v54 = vand.u32 4294901760, %v2437_v6  ;;  %v887_v59 = vand.u32 4294901760, %v886_v57 }
  0x43   : > { %1914 = vmatprep.subr.bf16.mxu0 %v2193_v3 }
  0x44   : > { %v893_v58 = vsub.f32 %v2437_v6, %v892_v54  ;;  %v2549_v37 = vpack.c.bf16 %v892_v54, %v885_v53 }
  0x45   : > { %1661 = vmatmul.mubr.f32.vlgmr.msra.gmra.mrb[0].mxu0 %v305_v32 }
  0x46   : > { %1916 = vmatpush3.bf16.msra.mxu0 %v2304_v12  ;;  %1671 = vmatprep.mubr.msk.f32.mxu0 %vm2194_vm0, %v2195_v8  ;;  %v777_v12 = vand.u32 4294901760, %v735_v9  ;;  %v894_v62 = vand.u32 4294901760, %v893_v58 }
  0x47   : > { %1917 = vmatprep.subr.bf16.mxu0 %v2193_v3 }
  0x48   : > { %v2454_v15 = vsub.f32 %v735_v9, %v777_v12  ;;  %v2484_v31 = vpack.c.bf16 %v777_v12, %v774_v11  ;;  %v2527_v0 = vpack.c.bf16 %v894_v62, %v887_v59  ;;  %v921_v11 = vsub.f32 %v2471_v25, %v920_v5 }
  0x49   : > { %v851_v59 = vsub.f32 %v2334_v23, %v850_v52  ;;  %v857_v62 = vand.u32 4294901760, %v2362_v41 }
  0x4a   : > { %1919 = vmatpush3.bf16.msra.mxu0 %v2318_v19  ;;  %v1981_v18 = vpack.c.bf16 %v2454_v15, %v2452_v14  ;;  %v780_v19 = vand.u32 4294901760, %v736_v16  ;;  %v906_v60 = vand.u32 4294901760, %v2454_v15  ;;  %v934_v14 = vand.u32 4294901760, %v2488_v33 }
  0x4b   : > { %1920 = vmatprep.subr.bf16.mxu0 %v2193_v3 }
  0x4c   : > { %1982 = vmatpush3.bf16.msra.mxu1 %v1981_v18  ;;  %v2469_v24 = vsub.f32 %v736_v16, %v780_v19  ;;  %v2501_v39 = vpack.c.bf16 %v783_v20, %v780_v19  ;;  %v907_v1 = vsub.f32 %v2454_v15, %v906_v60  ;;  %v922_v16 = vand.u32 4294901760, %v921_v11 }
  0x4d   : > { %1672 = vmatmul.mubr.f32.vlgmr.msra.gmra.mrb[0].mxu0 %v305_v32  ;;  %1983 = vmatprep.subr.bf16.mxu1 %v2193_v3  ;;  %v2486_v32 = vsub.f32 %v738_v26, %v786_v29  ;;  %v935_v19 = vsub.f32 %v2488_v33, %v934_v14  ;;  %v2551_v38 = vpack.c.bf16 %v906_v60, %v899_v63  ;;  %v864_v63 = vand.u32 4294901760, %v2368_v43 }
  0x4e   : > { %1922 = vmatpush3.bf16.msra.mxu0 %v2404_v55  ;;  %1706 = vmatprep.mubr.msk.f32.mxu0 %vm2194_vm0, %v2195_v8  ;;  %v1984_v28 = vpack.c.bf16 %v2471_v25, %v2469_v24  ;;  %v908_v7 = vand.u32 4294901760, %v907_v1  ;;  %v913_v9 = vand.u32 4294901760, %v2469_v24 }
  0x4f   : > { %1923 = vmatprep.subr.bf16.mxu0 %v2193_v3  ;;  %v1987_v36 = vpack.c.bf16 %v2488_v33, %v2486_v32  ;;  %v927_v17 = vand.u32 4294901760, %v2486_v32  ;;  %v936_v26 = vand.u32 4294901760, %v935_v19 }
  0x50   : > { %1985 = vmatpush3.bf16.msra.mxu1 %v1984_v28  ;;  %v2533_v10 = vpack.c.bf16 %v908_v7, %v901_v2  ;;  %v914_v6 = vsub.f32 %v2469_v24, %v913_v9  ;;  %v948_v28 = vand.u32 4294901760, %v947_v42  ;;  %v942_v24 = vsub.f32 %v940_v40, %v941_v27  ;;  %v1470_v40 = vld [vmem:[%s2695_s2] ss:$0 sm:$0xff] }
  0x51   : > { %1986 = vmatprep.subr.bf16.mxu1 %v2193_v3  ;;  %v928_v15 = vsub.f32 %v2486_v32, %v927_v17  ;;  %v2553_v32 = vpack.c.bf16 %v920_v5, %v913_v9  ;;  %v2555_v33 = vpack.c.bf16 %v934_v14, %v927_v17  ;;  %v852_v2 = vand.u32 4294901760, %v851_v59 }
  0x52   : > { %1925 = vmatpush3.bf16.msra.mxu0 %v2433_v4  ;;  %v915_v12 = vand.u32 4294901760, %v914_v6  ;;  %v949_v25 = vsub.f32 %v947_v42, %v948_v28  ;;  %v943_v30 = vand.u32 4294901760, %v942_v24  ;;  %v858_v7 = vsub.f32 %v2362_v41, %v857_v62 }
  0x53   : > { %1926 = vmatprep.subr.bf16.mxu0 %v2193_v3  ;;  %v929_v20 = vand.u32 4294901760, %v928_v15  ;;  %v865_v9 = vsub.f32 %v2368_v43, %v864_v63 }
  0x54   : > { %1988 = vmatpush3.bf16.msra.mxu1 %v1987_v36  ;;  %v2539_v18 = vpack.c.bf16 %v922_v16, %v915_v12  ;;  %v950_v34 = vand.u32 4294901760, %v949_v25  ;;  %v2547_v36 = vpack.c.bf16 %v878_v48, %v871_v47  ;;  %v843_v48 = vand.u32 4294901760, %v2329_v22 }
  0x55   : > { %1989 = vmatprep.subr.bf16.mxu1 %v2193_v3  ;;  %v2543_v29 = vpack.c.bf16 %v936_v26, %v929_v20  ;;  %v859_v6 = vand.u32 4294901760, %v858_v7  ;;  %v866_v11 = vand.u32 4294901760, %v865_v9 }
  0x56   : > { %1928 = vmatpush3.bf16.msra.mxu0 %v2450_v13  ;;  %v2545_v35 = vpack.c.bf16 %v950_v34, %v943_v30  ;;  %v844_v58 = vsub.f32 %v2329_v22, %v843_v48  ;;  %v2017_v43 = vpack.c.bf16 %v850_v52, %v843_v48 }
  0x57   : > { %1929 = vmatprep.subr.bf16.mxu0 %v2193_v3  ;;  %v1948_v41 = vpack.c.bf16 %v866_v11, %v859_v6 }
  0x58   : > { %1991 = vmatpush3.bf16.msra.mxu1 %v1990_v44  ;;  %v2557_v44 = vpack.c.bf16 %v948_v28, %v941_v27  ;;  %v845_v1 = vand.u32 4294901760, %v844_v58 }
  0x59   : > { %1992 = vmatprep.subr.bf16.mxu1 %v2193_v3 }
  0x5a   : > { %1931 = vmatpush3.bf16.msra.mxu0 %v2467_v21  ;;  %v1945_v23 = vpack.c.bf16 %v852_v2, %v845_v1 }
  0x5b   : > { %1932 = vmatprep.subr.bf16.mxu0 %v2193_v3 }
  0x5e   : > { %1934 = vmatpush3.bf16.msra.mxu0 %v2484_v31 }
  0x5f   : > { %1935 = vmatprep.subr.bf16.mxu0 %v2193_v3 }
  0x62   : > { %1937 = vmatpush3.bf16.msra.mxu0 %v2501_v39 }
  0x63   : > { %1938 = vmatprep.subr.bf16.mxu0 %v2193_v3 }
  0x66   : > { %1940 = vmatpush3.bf16.msra.mxu0 %v2506_v45 }
  0x67   : > { %1941 = vmatprep.subr.bf16.mxu0 %v2193_v3 }
  0x6a   : > { %1943 = vmatpush3.bf16.msra.mxu0 %v2511_v46 }
  0x6b   : > { %1944 = vmatprep.subr.bf16.mxu0 %v2193_v3 }
 0x120   : > { %v717_v42 = vpop.f32.mrb[0].mxu0 }
 0x121   : > { %v2064_v49 = vadd.f32 %v1470_v40, %v717_v42  ;;  %v1673_v50 = vpop.f32.mrb[1].mxu0 }
 0x123   : > { %v722_v51 = vmul.f32 0.70710677, %v2064_v49  ;;  %v721_v53 = vmul.f32 0.5, %v2064_v49 }
 0x125   : > { %2127 = verf.f32 %v722_v51 }
 0x12f   : > { %v2128_v47 = vpop.eup %2127 }
 0x130   : > { %v724_v54 = vadd.f32 1.0, %v2128_v47 }
 0x132   : > { %v725_v57 = vmul.f32 %v724_v54, %v721_v53 }
 0x134   : > { %v2568_v60 = vand.u32 4294901760, %v725_v57 }
 0x136   : > { %v831_v61 = vsub.f32 %v725_v57, %v2568_v60 }
 0x138   : > { %v832_v5 = vand.u32 4294901760, %v831_v61  ;;  %1777 = vmatmul.mubr.f32.vlgmr.msra.gmra.mrb[0].mxu1 %v831_v61 }
 0x139   : > { %1994 = vmatpush3.bf16.msra.mxu1 %v2404_v55  ;;  %1811 = vmatprep.mubr.msk.f32.mxu1 %vm2194_vm0, %v2195_v8 }
 0x13a   : > { %1995 = vmatprep.subr.bf16.mxu1 %v2193_v3  ;;  %v833_v22 = vsub.f32 %v831_v61, %v832_v5 }
 0x13c   : > { %v834_v12 = vand.u32 4294901760, %v833_v22 }
 0x13d   : > { %1997 = vmatpush3.bf16.msra.mxu1 %v2433_v4 }
 0x13e   : > { %1707 = vmatmul.mubr.f32.vlgmr.msra.gmra.mrb[2].mxu0 %v834_v12  ;;  %1998 = vmatprep.subr.bf16.mxu1 %v2193_v3 }
 0x13f   : > { %1946 = vmatpush3.bf16.msra.mxu0 %v1945_v23  ;;  %1741 = vmatprep.mubr.msk.f32.mxu0 %vm2194_vm0, %v2195_v8 }
 0x140   : > { %1947 = vmatprep.subr.bf16.mxu0 %v2193_v3 }
 0x141   : > { %2000 = vmatpush3.bf16.msra.mxu1 %v2450_v13 }
 0x142   : > { %2001 = vmatprep.subr.bf16.mxu1 %v2193_v3 }
 0x143   : > { %1949 = vmatpush3.bf16.msra.mxu0 %v1948_v41 }
 0x144   : > { %1950 = vmatprep.subr.bf16.mxu0 %v2193_v3 }
 0x145   : > { %2003 = vmatpush3.bf16.msra.mxu1 %v2467_v21 }
 0x146   : > { %2004 = vmatprep.subr.bf16.mxu1 %v2193_v3 }
 0x147   : > { %1952 = vmatpush3.bf16.msra.mxu0 %v2521_v56  ;;  %v2020_v56 = vpack.c.bf16 %v864_v63, %v857_v62 }
 0x148   : > { %1953 = vmatprep.subr.bf16.mxu0 %v2193_v3 }
 0x149   : > { %2006 = vmatpush3.bf16.msra.mxu1 %v2484_v31 }
 0x14a   : > { %2007 = vmatprep.subr.bf16.mxu1 %v2193_v3 }
 0x14b   : > { %1955 = vmatpush3.bf16.msra.mxu0 %v2527_v0 }
 0x14c   : > { %1956 = vmatprep.subr.bf16.mxu0 %v2193_v3 }
 0x14d   : > { %2009 = vmatpush3.bf16.msra.mxu1 %v2501_v39 }
 0x14e   : > { %2010 = vmatprep.subr.bf16.mxu1 %v2193_v3 }
 0x14f   : > { %1958 = vmatpush3.bf16.msra.mxu0 %v2533_v10 }
 0x150   : > { %1959 = vmatprep.subr.bf16.mxu0 %v2193_v3 }
 0x151   : > { %2012 = vmatpush3.bf16.msra.mxu1 %v2506_v45 }
 0x152   : > { %2013 = vmatprep.subr.bf16.mxu1 %v2193_v3 }
 0x153   : > { %1961 = vmatpush3.bf16.msra.mxu0 %v2539_v18 }
 0x154   : > { %1962 = vmatprep.subr.bf16.mxu0 %v2193_v3 }
 0x155   : > { %2015 = vmatpush3.bf16.msra.mxu1 %v2511_v46 }
 0x156   : > { %2016 = vmatprep.subr.bf16.mxu1 %v2193_v3 }
 0x157   : > { %1964 = vmatpush3.bf16.msra.mxu0 %v2543_v29 }
 0x158   : > { %1812 = vmatmul.mubr.f32.vlgmr.msra.gmra.mrb[0].mxu1 %v832_v5  ;;  %1965 = vmatprep.subr.bf16.mxu0 %v2193_v3 }
 0x159   : > { %2018 = vmatpush3.bf16.msra.mxu1 %v2017_v43  ;;  %1846 = vmatprep.mubr.msk.f32.mxu1 %vm2194_vm0, %v2195_v8 }
 0x15a   : > { %2019 = vmatprep.subr.bf16.mxu1 %v2193_v3 }
 0x15b   : > { %1967 = vmatpush3.bf16.msra.mxu0 %v2545_v35 }
 0x15d   : > { %2021 = vmatpush3.bf16.msra.mxu1 %v2020_v56 }
 0x15e   : > { %1742 = vmatmul.mubr.f32.vlgmr.msra.gmra.mrb[2].mxu0 %v2568_v60  ;;  %2022 = vmatprep.subr.bf16.mxu1 %v2193_v3 }
 0x161   : > { %2024 = vmatpush3.bf16.msra.mxu1 %v2547_v36 }
 0x162   : > { %2025 = vmatprep.subr.bf16.mxu1 %v2193_v3 }
 0x165   : > { %2027 = vmatpush3.bf16.msra.mxu1 %v2549_v37 }
 0x166   : > { %2028 = vmatprep.subr.bf16.mxu1 %v2193_v3 }
 0x169   : > { %2030 = vmatpush3.bf16.msra.mxu1 %v2551_v38 }
 0x16a   : > { %2031 = vmatprep.subr.bf16.mxu1 %v2193_v3 }
 0x16d   : > { %2033 = vmatpush3.bf16.msra.mxu1 %v2553_v32 }
 0x16e   : > { %2034 = vmatprep.subr.bf16.mxu1 %v2193_v3 }
 0x171   : > { %2036 = vmatpush3.bf16.msra.mxu1 %v2555_v33 }
 0x172   : > { %2037 = vmatprep.subr.bf16.mxu1 %v2193_v3 }
 0x175   : > { %2039 = vmatpush3.bf16.msra.mxu1 %v2557_v44 }
 0x176   : > { %2040 = vmatprep.subr.bf16.mxu1 %v2193_v3 }
 0x178   : > { %1847 = vmatmul.mubr.f32.vlgmr.msra.gmra.mrb[0].mxu1 %v2568_v60 }
 0x179   : > { %2042 = vmatpush3.bf16.msra.mxu1 %v2404_v55  ;;  %1881 = vmatprep.mubr.msk.f32.mxu1 %vm2194_vm0, %v2195_v8 }
 0x17a   : > { %2043 = vmatprep.subr.bf16.mxu1 %v2193_v3 }
 0x17d   : > { %2045 = vmatpush3.bf16.msra.mxu1 %v2433_v4  ;;  %v1471_v4 = vld [vmem:[%s2697_s4] ss:$0 sm:$0xff] }
 0x17e   : > { %2046 = vmatprep.subr.bf16.mxu1 %v2193_v3 }
 0x181   : > { %2048 = vmatpush3.bf16.msra.mxu1 %v2450_v13 }
 0x182   : > { %2049 = vmatprep.subr.bf16.mxu1 %v2193_v3 }
 0x185   : > { %2051 = vmatpush3.bf16.msra.mxu1 %v2467_v21 }
 0x186   : > { %2052 = vmatprep.subr.bf16.mxu1 %v2193_v3 }
 0x189   : > { %2054 = vmatpush3.bf16.msra.mxu1 %v2484_v31 }
 0x18a   : > { %2055 = vmatprep.subr.bf16.mxu1 %v2193_v3 }
 0x18d   : > { %2057 = vmatpush3.bf16.msra.mxu1 %v2501_v39 }
 0x18e   : > { %2058 = vmatprep.subr.bf16.mxu1 %v2193_v3 }
 0x191   : > { %2060 = vmatpush3.bf16.msra.mxu1 %v2506_v45 }
 0x192   : > { %2061 = vmatprep.subr.bf16.mxu1 %v2193_v3 }
 0x195   : > { %2063 = vmatpush3.bf16.msra.mxu1 %v2511_v46 }
 0x198   : > { %1882 = vmatmul.mubr.f32.vlgmr.msra.gmra.mrb[0].mxu1 %v2568_v60 }
 0x231   : > { %v987_v8 = vpop.f32.mrb[2].mxu0 }
 0x232   : > { %v1743_v55 = vpop.f32.mrb[3].mxu0  ;;  %v2065_v13 = vadd.f32 %v1471_v4, %v987_v8 }
 0x26b   : > { %v1386_v21 = vpop.f32.mrb[0].mxu1 }
 0x26c   : > { %v2066_v31 = vadd.f32 %v2065_v13, %v1386_v21  ;;  %v1883_v3 = vpop.f32.mrb[1].mxu1 }
 0x26e   : > { %1390 = vst.msk [vmem:[%s215_s9] sm:$0xff] %vm232_vm1, %v2066_v31 }
 0x26f   : > { %2142 = shalt.err (!%p2139_p3)
}
 0x270   : > { %s2143_s23 = scalar_lea.hbm %s2650_s13, 128  ;;  %s2147_s30 = scalar_lea.hbm %s2698_s5, 256 }
 0x271   : > { %p2144_p4 = scmp.ne.s32.totalorder %s2650_s13, %s2143_s23  ;;  %p2148_p9 = scmp.lt.u32.totalorder %s2650_s13, %s2698_s5 }
 0x272   : > { %p2149_p10 = scmp.lt.u32.totalorder %s2147_s30, %s2143_s23  ;;  %p2151_p12 = scmp.lt.u32.totalorder %s2143_s23, %s2650_s13 }
 0x273   : > { %p2145_p7 = pnand %p2144_p4, %p2265_p5 }
 0x274   : > { %p2150_p11 = por %p2149_p10, %p2148_p9 }
 0x275   : > { %p2146_p8 = pneg %p2145_p7 }
 0x276   : > { %p2152_p13 = por %p2151_p12, %p2150_p11 }
 0x278   : > { %p2153_p0 = pnand %p2152_p13, %p2146_p8 }
 0x27a   : > { %2156 = shalt.err (!%p2153_p0)
}
 0x27b   : > { %2085 = dma.vmem_to_hbm [thread:$0]  (%p2265_p5), %s2652_s10, 128, %s2650_s13, %s1392_s14  }
 0x27c PF: > { %p2091_p1 = scmp.ge.s32.totalorder %s2191_s21, 2  ;;  %s1417_s8 = sand.u32 1, %s2179_s18  }
 0x27d   : > { %s1418_s9 = scalar_lea.sflag [#allocation3], %s1417_s8 }
 0x27e   : > { %p2088_p2 = pnand %p2091_p1, %p2269_p6 }
 0x280   : > { %2174 = dma.done.wait (!%p2088_p2), %s1418_s9, 128  }
 0x281   : > { %2176 = vsyncadd (!%p2088_p2), %s1418_s9, 4294967168  ;;  %p15_p3 = scmp.ge.s32.totalorder %s2252_s24, 4   ;;  %s2701_s18 = smov %s2183_s19 }
 0x282   : > { %s2702_s19 = smov %s2187_s20  ;;  %s2703_s20 = smov %s2263_s27 }
 0x283   : > { %s2704_s21 = smov %s2252_s24  ;;  %17 = sbr.rel (!%p15_p3) target bundleno = 3 (0x3), region = 75 }
 0x28a   :  { %1423 = vsyncpa [#allocation3], 1 }
 0x28b   :  { %1425 = vsyncpa [#allocation3 + $0x1], 1 }

// kernel: tpu_custom_call.1
= control target key start
LH: loop header
LB: loop body
LE: loop exit
PB: predicated region body
PF: predicated region fallthrough
CT: control target
= control target key end

     0   :  { %10 = vsyncpa [#allocation3], 0  ;;  %s2693_s0 = inlined_call_operand.vmem [shape: f32[16,32], index: 0, kind: input, shape index: {}]   ;;  %s2694_s1 = inlined_call_operand.vmem [shape: f32[32,128], index: 1, kind: input, shape index: {}]   ;;  %s2695_s2 = inlined_call_operand.vmem [shape: f32[1,128], index: 2, kind: input, shape index: {}]   ;;  %s2696_s3 = inlined_call_operand.vmem [shape: f32[128,32], index: 3, kind: input, shape index: {}]   ;;  %s2697_s4 = inlined_call_operand.vmem [shape: f32[1,32], index: 4, kind: input, shape index: {}]   ;;  %s2698_s5 = inlined_call_operand.hbm [shape: f32[16,32], index: 5, kind: output, shape index: {}]  }
   0x1   :  { %12 = vsyncpa [#allocation3 + $0x1], 0  ;;  %s2227_s18 = smov 0   ;;  %s2229_s19 = smov 0  }
   0x2   :  { %s2231_s20 = smov 0   ;;  %s2233_s21 = smov 0  }
   0x3 LB: > { %s2248_s22 = sadd.s32 4294967295, %s2191_s21   ;;  %s1464_s23 = sadd.s32 4294967294, %s2191_s21   ;;  %s2191_s21 = sphi %s2233_s21, %s2704_s21   ;;  %s2187_s20 = sphi %s2231_s20, %s2703_s20   ;;  %s2183_s19 = sphi %s2229_s19, %s2702_s19   ;;  %s2179_s18 = sphi %s2227_s18, %s2701_s18  }
   0x4   : > { %s2252_s24 = sadd.s32 1, %s2191_s21   ;;  %s135_s25 = sadd.s32 1, %s2187_s20 }
   0x5   : > { %s132_s26 = ssub.s32 %s2191_s21, %s2252_s24  ;;  %p145_p0 = scmp.ne.s32.totalorder %s2187_s20, %s2183_s19 }
   0x6   : > { %p133_p1 = scmp.eq.s32.totalorder %s132_s26, 0  ;;  %p146_p2 = scmp.eq.s32.totalorder %s2248_s22, 1 }
   0x7   : > { %p151_p3 = scmp.ne.s32.totalorder %s2183_s19, %s2179_s18  ;;  %p152_p4 = scmp.eq.s32.totalorder %s1464_s23, 1 }
   0x8   : > { %s2263_s27 = scalar_select %p133_p1, %s2187_s20, %s135_s25  }
   0x9   : > { %p2265_p5 = por %p146_p2, %p145_p0  ;;  %p2269_p6 = por %p152_p4, %p151_p3 }
   0xa   : > { %p1467_p7 = scmp.ge.s32.totalorder %s2191_s21, 1  ;;  %p189_p8 = scmp.lt.s32.totalorder %s2191_s21, 3 }
   0xc   : > { %p190_p9 = pnand %p1467_p7, %p189_p8 }
   0xd   : > { %v221_v0 = vld [vmem:[%s2694_s1] sm:$0xff] (!%p190_p9)  ;;  %v222_v1 = vld [vmem:[%s2694_s1 + $0x8] sm:$0xff] (!%p190_p9)  ;;  %v223_v2 = vld [vmem:[%s2694_s1 + $0x10] sm:$0xff] (!%p190_p9)  ;;  %v2193_v3 = vmov (!%p190_p9), 0.0|0.0   ;;  %vm2194_vm0 = vmmov (!%p190_p9), 0   ;;  %v2195_v8 = vmov (!%p190_p9), 0.0  }
   0xe   : > { %193 = sbr.rel (%p190_p9) target bundleno = 636 (0x27c), region = 40  ;;  %1884 = vmatprep.subr.bf16.mxu0 (!%p190_p9), %v2193_v3  ;;  %v237_v4 = vand.u32 (!%p190_p9), 4294901760, %v221_v0  ;;  %v240_v5 = vand.u32 (!%p190_p9), 4294901760, %v222_v1  ;;  %v224_v6 = vld [vmem:[%s2694_s1 + $0x18] sm:$0xff] (!%p190_p9)  ;;  %v243_v7 = vand.u32 (!%p190_p9), 4294901760, %v223_v2  ;;  %1616 = vmatprep.mubr.msk.f32.mxu0 (!%p190_p9), %vm2194_vm0, %v2195_v8  ;;  %p216_p10 = scmp.lt.s32.totalorder (!%p190_p9), %s2248_s22, 1 }
   0xf   : > { %v246_v9 = vand.u32 (!%p190_p9), 4294901760, %v224_v6  ;;  %1968 = vmatprep.subr.bf16.mxu1 (!%p190_p9), %v2193_v3  ;;  %v2295_v10 = vld [vmem:[%s2696_s3] sm:$0xff] (!%p190_p9)  ;;  %v2300_v11 = vld [vmem:[%s2696_s3 + $0x8] sm:$0xff] (!%p190_p9)  ;;  %1776 = vmatprep.mubr.msk.f32.mxu1 (!%p190_p9), %vm2194_vm0, %v2195_v8  ;;  %vm232_vm1 = vcmask (!%p190_p9), 261120   ;;  %v2340_v26 = vld [vmem:[%s2696_s3 + $0x10] sm:$0xff] (!%p190_p9)  ;;  %s213_s26 = sand.u32 (!%p190_p9), 1, %s2183_s19  }
  0x10   : > { %v2304_v12 = vpack.c.bf16 (!%p190_p9), %v240_v5, %v237_v4  ;;  %v2306_v13 = vsub.f32 (!%p190_p9), %v221_v0, %v237_v4  ;;  %v2308_v14 = vsub.f32 (!%p190_p9), %v222_v1, %v240_v5  ;;  %v2310_v15 = vsub.f32 (!%p190_p9), %v223_v2, %v243_v7  ;;  %v2349_v31 = vld [vmem:[%s2696_s3 + $0x18] sm:$0xff] (!%p190_p9)  ;;  %v730_v56 = vld [vmem:[%s2696_s3 + $0x20] sm:$0xff] (!%p190_p9)  ;;  %v731_v57 = vld [vmem:[%s2696_s3 + $0x28] sm:$0xff] (!%p190_p9)  ;;  %s1473_s8 = sshll.u32 (!%p190_p9), %s2248_s22, 7  ;;  %s1392_s14 = scalar_lea.sflag (!%p190_p9), [#allocation3], %s213_s26 }
  0x11   : > { %v2313_v16 = vsub.f32 (!%p190_p9), %v224_v6, %v246_v9  ;;  %v750_v17 = vand.u32 (!%p190_p9), 4294901760, %v2295_v10  ;;  %v753_v18 = vand.u32 (!%p190_p9), 4294901760, %v2300_v11  ;;  %v2318_v19 = vpack.c.bf16 (!%p190_p9), %v246_v9, %v243_v7  ;;  %v732_v62 = vld [vmem:[%s2696_s3 + $0x30] sm:$0xff] (!%p190_p9)  ;;  %v733_v63 = vld [vmem:[%s2696_s3 + $0x38] sm:$0xff] (!%p190_p9)  ;;  %v734_v7 = vld [vmem:[%s2696_s3 + $0x40] sm:$0xff] (!%p190_p9)  ;;  %s2650_s13 = scalar_lea.hbm (!%p190_p9), %s2698_s5, %s1473_s8  ;;  %s2196_s15 = smov (!%p190_p9), [#allocation2]  }
  0x12   : > { %1886 = vmatpush3.bf16.msra.mxu0 (!%p190_p9), %v2304_v12  ;;  %v318_v20 = vand.u32 (!%p190_p9), 4294901760, %v2306_v13  ;;  %v325_v21 = vand.u32 (!%p190_p9), 4294901760, %v2308_v14  ;;  %v332_v25 = vand.u32 (!%p190_p9), 4294901760, %v2310_v15  ;;  %v756_v34 = vand.u32 (!%p190_p9), 4294901760, %v2340_v26  ;;  %v735_v9 = vld [vmem:[%s2696_s3 + $0x48] sm:$0xff] (!%p190_p9)  ;;  %s2133_s16 = sshll.u32 (!%p190_p9), %s2196_s15, 4  ;;  %s2134_s16 = int_to_ptr.vmem [resolvable:$false] %s2133_s16 }
  0x13   : > { %1887 = vmatprep.subr.bf16.mxu0 (!%p190_p9), %v2193_v3  ;;  %v2329_v22 = vsub.f32 (!%p190_p9), %v2295_v10, %v750_v17  ;;  %v2334_v23 = vsub.f32 (!%p190_p9), %v2300_v11, %v753_v18  ;;  %v339_v30 = vand.u32 (!%p190_p9), 4294901760, %v2313_v16  ;;  %v759_v37 = vand.u32 (!%p190_p9), 4294901760, %v2349_v31 }
  0x14   : > { %v319_v28 = vsub.f32 (!%p190_p9), %v2306_v13, %v318_v20  ;;  %v326_v29 = vsub.f32 (!%p190_p9), %v2308_v14, %v325_v21  ;;  %v333_v36 = vsub.f32 (!%p190_p9), %v2310_v15, %v332_v25  ;;  %v2362_v41 = vsub.f32 (!%p190_p9), %v2340_v26, %v756_v34  ;;  %v738_v26 = vld [vmem:[%s2696_s3 + $0x60] sm:$0xff] (!%p190_p9) }
  0x15   : > { %s217_s17 = scalar_select %p216_p10, %s2248_s22, 1  ;;  %v1969_v33 = vpack.c.bf16 %v2334_v23, %v2329_v22  ;;  %v340_v40 = vsub.f32 %v2313_v16, %v339_v30  ;;  %v2368_v43 = vsub.f32 %v2349_v31, %v759_v37  ;;  %v1897_v51 = vpack.c.bf16 %v2308_v14, %v2306_v13 }
  0x16   : > { %1889 = vmatpush3.bf16.msra.mxu0 %v2318_v19  ;;  %v320_v38 = vand.u32 4294901760, %v319_v28  ;;  %v327_v39 = vand.u32 4294901760, %v326_v29  ;;  %v334_v47 = vand.u32 4294901760, %v333_v36  ;;  %v1900_v52 = vpack.c.bf16 %v2313_v16, %v2310_v15  ;;  %v736_v16 = vld [vmem:[%s2696_s3 + $0x50] sm:$0xff] }
  0x17   : > { %s1469_s23 = sshll.u32 %s217_s17, 3  ;;  %1890 = vmatprep.subr.bf16.mxu0 %v2193_v3  ;;  %1970 = vmatpush3.bf16.msra.mxu1 %v1969_v33  ;;  %v1972_v45 = vpack.c.bf16 %v2368_v43, %v2362_v41  ;;  %v341_v48 = vand.u32 4294901760, %v340_v40  ;;  %v1909_v53 = vpack.c.bf16 %v325_v21, %v318_v20  ;;  %v1912_v54 = vpack.c.bf16 %v339_v30, %v332_v25  ;;  %s2135_s17 = scalar_lea.vmem %s2134_s16, 256 }
  0x18   : > { %s219_s30 = scalar_lea.vmem %s2693_s0, %s1469_s23  ;;  %1971 = vmatprep.subr.bf16.mxu1 %v2193_v3  ;;  %v1891_v46 = vpack.c.bf16 %v327_v39, %v320_v38  ;;  %v2404_v55 = vpack.c.bf16 %v753_v18, %v750_v17  ;;  %v762_v58 = vand.u32 4294901760, %v730_v56  ;;  %v765_v59 = vand.u32 4294901760, %v731_v57  ;;  %v737_v17 = vld [vmem:[%s2696_s3 + $0x58] sm:$0xff] }
  0x19   : > { %v220_v24 = vld [vmem:[%s219_s30] sm:$0xff]  ;;  %v1894_v50 = vpack.c.bf16 %v341_v48, %v334_v47  ;;  %v768_v1 = vand.u32 4294901760, %v732_v62  ;;  %v771_v2 = vand.u32 4294901760, %v733_v63  ;;  %v2433_v4 = vpack.c.bf16 %v759_v37, %v756_v34  ;;  %v740_v34 = vld [vmem:[%s2696_s3 + $0x70] sm:$0xff]  ;;  %s1468_s30 = sshll.u32 %s213_s26, 3 }
  0x1a   : > { %v234_v27 = vsel %vm232_vm1, %v220_v24, 0  ;;  %v2417_v60 = vsub.f32 %v730_v56, %v762_v58  ;;  %v2419_v61 = vsub.f32 %v731_v57, %v765_v59  ;;  %v774_v11 = vand.u32 4294901760, %v734_v7  ;;  %s215_s9 = scalar_lea.vmem [#allocation2], %s1468_s30 }
  0x1b   : > { %v305_v32 = vand.u32 4294901760, %v234_v27  ;;  %1973 = vmatpush3.bf16.msra.mxu1 %v1972_v45  ;;  %v2435_v5 = vsub.f32 %v732_v62, %v768_v1  ;;  %v2437_v6 = vsub.f32 %v733_v63, %v771_v2  ;;  %v2450_v13 = vpack.c.bf16 %v765_v59, %v762_v58  ;;  %s1405_s10 = sshll.u32 %s215_s9, 4  ;;  %s2652_s10 = int_to_ptr.vmem [resolvable:$true] %s1405_s10 }
  0x1c   : > { %1974 = vmatprep.subr.bf16.mxu1 %v2193_v3  ;;  %v1975_v0 = vpack.c.bf16 %v2419_v61, %v2417_v60  ;;  %v2452_v14 = vsub.f32 %v734_v7, %v774_v11  ;;  %v783_v20 = vand.u32 4294901760, %v737_v17  ;;  %v2467_v21 = vpack.c.bf16 %v771_v2, %v768_v1  ;;  %s2129_s22 = scalar_lea.vmem %s2652_s10, 128  ;;  %p2136_p0 = scmp.lt.s32.totalorder %s2652_s10, %s2134_s16 }
  0x1d   : > { %v306_v35 = vsub.f32 %v234_v27, %v305_v32  ;;  %v1978_v10 = vpack.c.bf16 %v2437_v6, %v2435_v5  ;;  %v739_v27 = vld [vmem:[%s2696_s3 + $0x68] sm:$0xff]  ;;  %v786_v29 = vand.u32 4294901760, %v738_v26  ;;  %v792_v37 = vand.u32 4294901760, %v740_v34  ;;  %p2130_p11 = scmp.ne.s32.totalorder %s2652_s10, %s2129_s22  ;;  %p2137_p1 = scmp.lt.s32.totalorder %s2135_s17, %s2129_s22 }
  0x1e   : > { %v2471_v25 = vsub.f32 %v737_v17, %v783_v20  ;;  %v789_v30 = vand.u32 4294901760, %v739_v27  ;;  %v871_v47 = vand.u32 4294901760, %v2417_v60  ;;  %v878_v48 = vand.u32 4294901760, %v2419_v61 }
  0x1f   : > { %v307_v42 = vand.u32 4294901760, %v306_v35  ;;  %1976 = vmatpush3.bf16.msra.mxu1 %v1975_v0  ;;  %v940_v40 = vsub.f32 %v740_v34, %v792_v37  ;;  %v899_v63 = vand.u32 4294901760, %v2452_v14  ;;  %p2131_p12 = pnand %p2130_p11, %p2265_p5  ;;  %p2138_p2 = por %p2137_p1, %p2136_p0 }
  0x20   : > { %1977 = vmatprep.subr.bf16.mxu1 %v2193_v3  ;;  %v2488_v33 = vsub.f32 %v739_v27, %v789_v30  ;;  %v2506_v45 = vpack.c.bf16 %v789_v30, %v786_v29 }
  0x21   : > { %v308_v44 = vsub.f32 %v306_v35, %v307_v42  ;;  %v941_v27 = vand.u32 4294901760, %v940_v40  ;;  %p2132_p13 = pneg %p2131_p12 }
  0x23   : > { %v309_v49 = vand.u32 4294901760, %v308_v44  ;;  %1979 = vmatpush3.bf16.msra.mxu1 %v1978_v10  ;;  %p2139_p3 = pnand %p2138_p2, %p2132_p13 }
  0x24   : > { %1980 = vmatprep.subr.bf16.mxu1 %v2193_v3 }
  0x25   : > { %1617 = vmatmul.mubr.f32.vlgmr.msra.gmra.mrb[0].mxu0 %v309_v49  ;;  %v872_v49 = vsub.f32 %v2417_v60, %v871_v47 }
  0x26   : > { %1892 = vmatpush3.bf16.msra.mxu0 %v1891_v46  ;;  %1627 = vmatprep.mubr.msk.f32.mxu0 %vm2194_vm0, %v2195_v8 }
  0x27   : > { %1893 = vmatprep.subr.bf16.mxu0 %v2193_v3 }
  0x2a   : > { %1895 = vmatpush3.bf16.msra.mxu0 %v1894_v50  ;;  %v879_v50 = vsub.f32 %v2419_v61, %v878_v48  ;;  %v900_v61 = vsub.f32 %v2452_v14, %v899_v63 }
  0x2b   : > { %1896 = vmatprep.subr.bf16.mxu0 %v2193_v3 }
  0x2c   : > { %v901_v2 = vand.u32 4294901760, %v900_v61 }
  0x2d   : > { %1628 = vmatmul.mubr.f32.vlgmr.msra.gmra.mrb[0].mxu0 %v305_v32 }
  0x2e   : > { %1898 = vmatpush3.bf16.msra.mxu0 %v1897_v51  ;;  %1638 = vmatprep.mubr.msk.f32.mxu0 %vm2194_vm0, %v2195_v8  ;;  %v873_v51 = vand.u32 4294901760, %v872_v49 }
  0x2f   : > { %1899 = vmatprep.subr.bf16.mxu0 %v2193_v3 }
  0x32   : > { %1901 = vmatpush3.bf16.msra.mxu0 %v1900_v52  ;;  %v880_v52 = vand.u32 4294901760, %v879_v50 }
  0x33   : > { %1902 = vmatprep.subr.bf16.mxu0 %v2193_v3 }
  0x34   : > { %v2521_v56 = vpack.c.bf16 %v880_v52, %v873_v51  ;;  %v850_v52 = vand.u32 4294901760, %v2334_v23 }
  0x35   : > { %1639 = vmatmul.mubr.f32.vlgmr.msra.gmra.mrb[0].mxu0 %v306_v35  ;;  %v741_v35 = vld [vmem:[%s2696_s3 + $0x78] sm:$0xff] }
  0x36   : > { %1904 = vmatpush3.bf16.msra.mxu0 %v2304_v12  ;;  %1649 = vmatprep.mubr.msk.f32.mxu0 %vm2194_vm0, %v2195_v8  ;;  %v795_v38 = vand.u32 4294901760, %v741_v35 }
  0x37   : > { %1905 = vmatprep.subr.bf16.mxu0 %v2193_v3 }
  0x38   : > { %v2511_v46 = vpack.c.bf16 %v795_v38, %v792_v37 }
  0x3a   : > { %1907 = vmatpush3.bf16.msra.mxu0 %v2318_v19 }
  0x3b   : > { %1908 = vmatprep.subr.bf16.mxu0 %v2193_v3 }
  0x3d   : > { %1650 = vmatmul.mubr.f32.vlgmr.msra.gmra.mrb[0].mxu0 %v307_v42  ;;  %v947_v42 = vsub.f32 %v741_v35, %v795_v38 }
  0x3e   : > { %1910 = vmatpush3.bf16.msra.mxu0 %v1909_v53  ;;  %1660 = vmatprep.mubr.msk.f32.mxu0 %vm2194_vm0, %v2195_v8  ;;  %v885_v53 = vand.u32 4294901760, %v2435_v5 }
  0x3f   : > { %1911 = vmatprep.subr.bf16.mxu0 %v2193_v3  ;;  %v1990_v44 = vpack.c.bf16 %v947_v42, %v940_v40 }
  0x40   : > { %v886_v57 = vsub.f32 %v2435_v5, %v885_v53  ;;  %v920_v5 = vand.u32 4294901760, %v2471_v25 }
  0x42   : > { %1913 = vmatpush3.bf16.msra.mxu0 %v1912_v54  ;;  %v892_v54 = vand.u32 4294901760, %v2437_v6  ;;  %v887_v59 = vand.u32 4294901760, %v886_v57 }
  0x43   : > { %1914 = vmatprep.subr.bf16.mxu0 %v2193_v3 }
  0x44   : > { %v893_v58 = vsub.f32 %v2437_v6, %v892_v54  ;;  %v2549_v37 = vpack.c.bf16 %v892_v54, %v885_v53 }
  0x45   : > { %1661 = vmatmul.mubr.f32.vlgmr.msra.gmra.mrb[0].mxu0 %v305_v32 }
  0x46   : > { %1916 = vmatpush3.bf16.msra.mxu0 %v2304_v12  ;;  %1671 = vmatprep.mubr.msk.f32.mxu0 %vm2194_vm0, %v2195_v8  ;;  %v777_v12 = vand.u32 4294901760, %v735_v9  ;;  %v894_v62 = vand.u32 4294901760, %v893_v58 }
  0x47   : > { %1917 = vmatprep.subr.bf16.mxu0 %v2193_v3 }
  0x48   : > { %v2454_v15 = vsub.f32 %v735_v9, %v777_v12  ;;  %v2484_v31 = vpack.c.bf16 %v777_v12, %v774_v11  ;;  %v2527_v0 = vpack.c.bf16 %v894_v62, %v887_v59  ;;  %v921_v11 = vsub.f32 %v2471_v25, %v920_v5 }
  0x49   : > { %v851_v59 = vsub.f32 %v2334_v23, %v850_v52  ;;  %v857_v62 = vand.u32 4294901760, %v2362_v41 }
  0x4a   : > { %1919 = vmatpush3.bf16.msra.mxu0 %v2318_v19  ;;  %v1981_v18 = vpack.c.bf16 %v2454_v15, %v2452_v14  ;;  %v780_v19 = vand.u32 4294901760, %v736_v16  ;;  %v906_v60 = vand.u32 4294901760, %v2454_v15  ;;  %v934_v14 = vand.u32 4294901760, %v2488_v33 }
  0x4b   : > { %1920 = vmatprep.subr.bf16.mxu0 %v2193_v3 }
  0x4c   : > { %1982 = vmatpush3.bf16.msra.mxu1 %v1981_v18  ;;  %v2469_v24 = vsub.f32 %v736_v16, %v780_v19  ;;  %v2501_v39 = vpack.c.bf16 %v783_v20, %v780_v19  ;;  %v907_v1 = vsub.f32 %v2454_v15, %v906_v60  ;;  %v922_v16 = vand.u32 4294901760, %v921_v11 }
  0x4d   : > { %1672 = vmatmul.mubr.f32.vlgmr.msra.gmra.mrb[0].mxu0 %v305_v32  ;;  %1983 = vmatprep.subr.bf16.mxu1 %v2193_v3  ;;  %v2486_v32 = vsub.f32 %v738_v26, %v786_v29  ;;  %v935_v19 = vsub.f32 %v2488_v33, %v934_v14  ;;  %v2551_v38 = vpack.c.bf16 %v906_v60, %v899_v63  ;;  %v864_v63 = vand.u32 4294901760, %v2368_v43 }
  0x4e   : > { %1922 = vmatpush3.bf16.msra.mxu0 %v2404_v55  ;;  %1706 = vmatprep.mubr.msk.f32.mxu0 %vm2194_vm0, %v2195_v8  ;;  %v1984_v28 = vpack.c.bf16 %v2471_v25, %v2469_v24  ;;  %v908_v7 = vand.u32 4294901760, %v907_v1  ;;  %v913_v9 = vand.u32 4294901760, %v2469_v24 }
  0x4f   : > { %1923 = vmatprep.subr.bf16.mxu0 %v2193_v3  ;;  %v1987_v36 = vpack.c.bf16 %v2488_v33, %v2486_v32  ;;  %v927_v17 = vand.u32 4294901760, %v2486_v32  ;;  %v936_v26 = vand.u32 4294901760, %v935_v19 }
  0x50   : > { %1985 = vmatpush3.bf16.msra.mxu1 %v1984_v28  ;;  %v2533_v10 = vpack.c.bf16 %v908_v7, %v901_v2  ;;  %v914_v6 = vsub.f32 %v2469_v24, %v913_v9  ;;  %v948_v28 = vand.u32 4294901760, %v947_v42  ;;  %v942_v24 = vsub.f32 %v940_v40, %v941_v27  ;;  %v1470_v40 = vld [vmem:[%s2695_s2] ss:$0 sm:$0xff] }
  0x51   : > { %1986 = vmatprep.subr.bf16.mxu1 %v2193_v3  ;;  %v928_v15 = vsub.f32 %v2486_v32, %v927_v17  ;;  %v2553_v32 = vpack.c.bf16 %v920_v5, %v913_v9  ;;  %v2555_v33 = vpack.c.bf16 %v934_v14, %v927_v17  ;;  %v852_v2 = vand.u32 4294901760, %v851_v59 }
  0x52   : > { %1925 = vmatpush3.bf16.msra.mxu0 %v2433_v4  ;;  %v915_v12 = vand.u32 4294901760, %v914_v6  ;;  %v949_v25 = vsub.f32 %v947_v42, %v948_v28  ;;  %v943_v30 = vand.u32 4294901760, %v942_v24  ;;  %v858_v7 = vsub.f32 %v2362_v41, %v857_v62 }
  0x53   : > { %1926 = vmatprep.subr.bf16.mxu0 %v2193_v3  ;;  %v929_v20 = vand.u32 4294901760, %v928_v15  ;;  %v865_v9 = vsub.f32 %v2368_v43, %v864_v63 }
  0x54   : > { %1988 = vmatpush3.bf16.msra.mxu1 %v1987_v36  ;;  %v2539_v18 = vpack.c.bf16 %v922_v16, %v915_v12  ;;  %v950_v34 = vand.u32 4294901760, %v949_v25  ;;  %v2547_v36 = vpack.c.bf16 %v878_v48, %v871_v47  ;;  %v843_v48 = vand.u32 4294901760, %v2329_v22 }
  0x55   : > { %1989 = vmatprep.subr.bf16.mxu1 %v2193_v3  ;;  %v2543_v29 = vpack.c.bf16 %v936_v26, %v929_v20  ;;  %v859_v6 = vand.u32 4294901760, %v858_v7  ;;  %v866_v11 = vand.u32 4294901760, %v865_v9 }
  0x56   : > { %1928 = vmatpush3.bf16.msra.mxu0 %v2450_v13  ;;  %v2545_v35 = vpack.c.bf16 %v950_v34, %v943_v30  ;;  %v844_v58 = vsub.f32 %v2329_v22, %v843_v48  ;;  %v2017_v43 = vpack.c.bf16 %v850_v52, %v843_v48 }
  0x57   : > { %1929 = vmatprep.subr.bf16.mxu0 %v2193_v3  ;;  %v1948_v41 = vpack.c.bf16 %v866_v11, %v859_v6 }
  0x58   : > { %1991 = vmatpush3.bf16.msra.mxu1 %v1990_v44  ;;  %v2557_v44 = vpack.c.bf16 %v948_v28, %v941_v27  ;;  %v845_v1 = vand.u32 4294901760, %v844_v58 }
  0x59   : > { %1992 = vmatprep.subr.bf16.mxu1 %v2193_v3 }
  0x5a   : > { %1931 = vmatpush3.bf16.msra.mxu0 %v2467_v21  ;;  %v1945_v23 = vpack.c.bf16 %v852_v2, %v845_v1 }
  0x5b   : > { %1932 = vmatprep.subr.bf16.mxu0 %v2193_v3 }
  0x5e   : > { %1934 = vmatpush3.bf16.msra.mxu0 %v2484_v31 }
  0x5f   : > { %1935 = vmatprep.subr.bf16.mxu0 %v2193_v3 }
  0x62   : > { %1937 = vmatpush3.bf16.msra.mxu0 %v2501_v39 }
  0x63   : > { %1938 = vmatprep.subr.bf16.mxu0 %v2193_v3 }
  0x66   : > { %1940 = vmatpush3.bf16.msra.mxu0 %v2506_v45 }
  0x67   : > { %1941 = vmatprep.subr.bf16.mxu0 %v2193_v3 }
  0x6a   : > { %1943 = vmatpush3.bf16.msra.mxu0 %v2511_v46 }
  0x6b   : > { %1944 = vmatprep.subr.bf16.mxu0 %v2193_v3 }
 0x120   : > { %v717_v42 = vpop.f32.mrb[0].mxu0 }
 0x121   : > { %v2064_v49 = vadd.f32 %v1470_v40, %v717_v42  ;;  %v1673_v50 = vpop.f32.mrb[1].mxu0 }
 0x123   : > { %v722_v51 = vmul.f32 0.70710677, %v2064_v49  ;;  %v721_v53 = vmul.f32 0.5, %v2064_v49 }
 0x125   : > { %2127 = verf.f32 %v722_v51 }
 0x12f   : > { %v2128_v47 = vpop.eup %2127 }
 0x130   : > { %v724_v54 = vadd.f32 1.0, %v2128_v47 }
 0x132   : > { %v725_v57 = vmul.f32 %v724_v54, %v721_v53 }
 0x134   : > { %v2568_v60 = vand.u32 4294901760, %v725_v57 }
 0x136   : > { %v831_v61 = vsub.f32 %v725_v57, %v2568_v60 }
 0x138   : > { %v832_v5 = vand.u32 4294901760, %v831_v61  ;;  %1777 = vmatmul.mubr.f32.vlgmr.msra.gmra.mrb[0].mxu1 %v831_v61 }
 0x139   : > { %1994 = vmatpush3.bf16.msra.mxu1 %v2404_v55  ;;  %1811 = vmatprep.mubr.msk.f32.mxu1 %vm2194_vm0, %v2195_v8 }
 0x13a   : > { %1995 = vmatprep.subr.bf16.mxu1 %v2193_v3  ;;  %v833_v22 = vsub.f32 %v831_v61, %v832_v5 }
 0x13c   : > { %v834_v12 = vand.u32 4294901760, %v833_v22 }
 0x13d   : > { %1997 = vmatpush3.bf16.msra.mxu1 %v2433_v4 }
 0x13e   : > { %1707 = vmatmul.mubr.f32.vlgmr.msra.gmra.mrb[2].mxu0 %v834_v12  ;;  %1998 = vmatprep.subr.bf16.mxu1 %v2193_v3 }
 0x13f   : > { %1946 = vmatpush3.bf16.msra.mxu0 %v1945_v23  ;;  %1741 = vmatprep.mubr.msk.f32.mxu0 %vm2194_vm0, %v2195_v8 }
 0x140   : > { %1947 = vmatprep.subr.bf16.mxu0 %v2193_v3 }
 0x141   : > { %2000 = vmatpush3.bf16.msra.mxu1 %v2450_v13 }
 0x142   : > { %2001 = vmatprep.subr.bf16.mxu1 %v2193_v3 }
 0x143   : > { %1949 = vmatpush3.bf16.msra.mxu0 %v1948_v41 }
 0x144   : > { %1950 = vmatprep.subr.bf16.mxu0 %v2193_v3 }
 0x145   : > { %2003 = vmatpush3.bf16.msra.mxu1 %v2467_v21 }
 0x146   : > { %2004 = vmatprep.subr.bf16.mxu1 %v2193_v3 }
 0x147   : > { %1952 = vmatpush3.bf16.msra.mxu0 %v2521_v56  ;;  %v2020_v56 = vpack.c.bf16 %v864_v63, %v857_v62 }
 0x148   : > { %1953 = vmatprep.subr.bf16.mxu0 %v2193_v3 }
 0x149   : > { %2006 = vmatpush3.bf16.msra.mxu1 %v2484_v31 }
 0x14a   : > { %2007 = vmatprep.subr.bf16.mxu1 %v2193_v3 }
 0x14b   : > { %1955 = vmatpush3.bf16.msra.mxu0 %v2527_v0 }
 0x14c   : > { %1956 = vmatprep.subr.bf16.mxu0 %v2193_v3 }
 0x14d   : > { %2009 = vmatpush3.bf16.msra.mxu1 %v2501_v39 }
 0x14e   : > { %2010 = vmatprep.subr.bf16.mxu1 %v2193_v3 }
 0x14f   : > { %1958 = vmatpush3.bf16.msra.mxu0 %v2533_v10 }
 0x150   : > { %1959 = vmatprep.subr.bf16.mxu0 %v2193_v3 }
 0x151   : > { %2012 = vmatpush3.bf16.msra.mxu1 %v2506_v45 }
 0x152   : > { %2013 = vmatprep.subr.bf16.mxu1 %v2193_v3 }
 0x153   : > { %1961 = vmatpush3.bf16.msra.mxu0 %v2539_v18 }
 0x154   : > { %1962 = vmatprep.subr.bf16.mxu0 %v2193_v3 }
 0x155   : > { %2015 = vmatpush3.bf16.msra.mxu1 %v2511_v46 }
 0x156   : > { %2016 = vmatprep.subr.bf16.mxu1 %v2193_v3 }
 0x157   : > { %1964 = vmatpush3.bf16.msra.mxu0 %v2543_v29 }
 0x158   : > { %1812 = vmatmul.mubr.f32.vlgmr.msra.gmra.mrb[0].mxu1 %v832_v5  ;;  %1965 = vmatprep.subr.bf16.mxu0 %v2193_v3 }
 0x159   : > { %2018 = vmatpush3.bf16.msra.mxu1 %v2017_v43  ;;  %1846 = vmatprep.mubr.msk.f32.mxu1 %vm2194_vm0, %v2195_v8 }
 0x15a   : > { %2019 = vmatprep.subr.bf16.mxu1 %v2193_v3 }
 0x15b   : > { %1967 = vmatpush3.bf16.msra.mxu0 %v2545_v35 }
 0x15d   : > { %2021 = vmatpush3.bf16.msra.mxu1 %v2020_v56 }
 0x15e   : > { %1742 = vmatmul.mubr.f32.vlgmr.msra.gmra.mrb[2].mxu0 %v2568_v60  ;;  %2022 = vmatprep.subr.bf16.mxu1 %v2193_v3 }
 0x161   : > { %2024 = vmatpush3.bf16.msra.mxu1 %v2547_v36 }
 0x162   : > { %2025 = vmatprep.subr.bf16.mxu1 %v2193_v3 }
 0x165   : > { %2027 = vmatpush3.bf16.msra.mxu1 %v2549_v37 }
 0x166   : > { %2028 = vmatprep.subr.bf16.mxu1 %v2193_v3 }
 0x169   : > { %2030 = vmatpush3.bf16.msra.mxu1 %v2551_v38 }
 0x16a   : > { %2031 = vmatprep.subr.bf16.mxu1 %v2193_v3 }
 0x16d   : > { %2033 = vmatpush3.bf16.msra.mxu1 %v2553_v32 }
 0x16e   : > { %2034 = vmatprep.subr.bf16.mxu1 %v2193_v3 }
 0x171   : > { %2036 = vmatpush3.bf16.msra.mxu1 %v2555_v33 }
 0x172   : > { %2037 = vmatprep.subr.bf16.mxu1 %v2193_v3 }
 0x175   : > { %2039 = vmatpush3.bf16.msra.mxu1 %v2557_v44 }
 0x176   : > { %2040 = vmatprep.subr.bf16.mxu1 %v2193_v3 }
 0x178   : > { %1847 = vmatmul.mubr.f32.vlgmr.msra.gmra.mrb[0].mxu1 %v2568_v60 }
 0x179   : > { %2042 = vmatpush3.bf16.msra.mxu1 %v2404_v55  ;;  %1881 = vmatprep.mubr.msk.f32.mxu1 %vm2194_vm0, %v2195_v8 }
 0x17a   : > { %2043 = vmatprep.subr.bf16.mxu1 %v2193_v3 }
 0x17d   : > { %2045 = vmatpush3.bf16.msra.mxu1 %v2433_v4  ;;  %v1471_v4 = vld [vmem:[%s2697_s4] ss:$0 sm:$0xff] }
 0x17e   : > { %2046 = vmatprep.subr.bf16.mxu1 %v2193_v3 }
 0x181   : > { %2048 = vmatpush3.bf16.msra.mxu1 %v2450_v13 }
 0x182   : > { %2049 = vmatprep.subr.bf16.mxu1 %v2193_v3 }
 0x185   : > { %2051 = vmatpush3.bf16.msra.mxu1 %v2467_v21 }
 0x186   : > { %2052 = vmatprep.subr.bf16.mxu1 %v2193_v3 }
 0x189   : > { %2054 = vmatpush3.bf16.msra.mxu1 %v2484_v31 }
 0x18a   : > { %2055 = vmatprep.subr.bf16.mxu1 %v2193_v3 }
 0x18d   : > { %2057 = vmatpush3.bf16.msra.mxu1 %v2501_v39 }
 0x18e   : > { %2058 = vmatprep.subr.bf16.mxu1 %v2193_v3 }
 0x191   : > { %2060 = vmatpush3.bf16.msra.mxu1 %v2506_v45 }
 0x192   : > { %2061 = vmatprep.subr.bf16.mxu1 %v2193_v3 }
 0x195   : > { %2063 = vmatpush3.bf16.msra.mxu1 %v2511_v46 }
 0x198   : > { %1882 = vmatmul.mubr.f32.vlgmr.msra.gmra.mrb[0].mxu1 %v2568_v60 }
 0x231   : > { %v987_v8 = vpop.f32.mrb[2].mxu0 }
 0x232   : > { %v1743_v55 = vpop.f32.mrb[3].mxu0  ;;  %v2065_v13 = vadd.f32 %v1471_v4, %v987_v8 }
 0x26b   : > { %v1386_v21 = vpop.f32.mrb[0].mxu1 }
 0x26c   : > { %v2066_v31 = vadd.f32 %v2065_v13, %v1386_v21  ;;  %v1883_v3 = vpop.f32.mrb[1].mxu1 }
 0x26e   : > { %1390 = vst.msk [vmem:[%s215_s9] sm:$0xff] %vm232_vm1, %v2066_v31 }
 0x26f   : > { %2142 = shalt.err (!%p2139_p3)
}
 0x270   : > { %s2143_s23 = scalar_lea.hbm %s2650_s13, 128  ;;  %s2147_s30 = scalar_lea.hbm %s2698_s5, 256 }
 0x271   : > { %p2144_p4 = scmp.ne.s32.totalorder %s2650_s13, %s2143_s23  ;;  %p2148_p9 = scmp.lt.u32.totalorder %s2650_s13, %s2698_s5 }
 0x272   : > { %p2149_p10 = scmp.lt.u32.totalorder %s2147_s30, %s2143_s23  ;;  %p2151_p12 = scmp.lt.u32.totalorder %s2143_s23, %s2650_s13 }
 0x273   : > { %p2145_p7 = pnand %p2144_p4, %p2265_p5 }
 0x274   : > { %p2150_p11 = por %p2149_p10, %p2148_p9 }
 0x275   : > { %p2146_p8 = pneg %p2145_p7 }
 0x276   : > { %p2152_p13 = por %p2151_p12, %p2150_p11 }
 0x278   : > { %p2153_p0 = pnand %p2152_p13, %p2146_p8 }
 0x27a   : > { %2156 = shalt.err (!%p2153_p0)
}
 0x27b   : > { %2085 = dma.vmem_to_hbm [thread:$0]  (%p2265_p5), %s2652_s10, 128, %s2650_s13, %s1392_s14  }
 0x27c PF: > { %p2091_p1 = scmp.ge.s32.totalorder %s2191_s21, 2  ;;  %s1417_s8 = sand.u32 1, %s2179_s18  }
 0x27d   : > { %s1418_s9 = scalar_lea.sflag [#allocation3], %s1417_s8 }
 0x27e   : > { %p2088_p2 = pnand %p2091_p1, %p2269_p6 }
 0x280   : > { %2174 = dma.done.wait (!%p2088_p2), %s1418_s9, 128  }
 0x281   : > { %2176 = vsyncadd (!%p2088_p2), %s1418_s9, 4294967168  ;;  %p15_p3 = scmp.ge.s32.totalorder %s2252_s24, 4   ;;  %s2701_s18 = smov %s2183_s19 }
 0x282   : > { %s2702_s19 = smov %s2187_s20  ;;  %s2703_s20 = smov %s2263_s27 }
 0x283   : > { %s2704_s21 = smov %s2252_s24  ;;  %17 = sbr.rel (!%p15_p3) target bundleno = 3 (0x3), region = 75 }
 0x28a   :  { %1423 = vsyncpa [#allocation3], 1 }
 0x28b   :  { %1425 = vsyncpa [#allocation3 + $0x1], 1 }

</bundles_post_ra>
